<compile_context>
chip_gen: v7x
topology: tpu7x:2x2x1
jax: 0.10.0
libtpu: 0.0.40
codegen_flags: <defaults>
</compile_context>

<pallas_src>
import functools

import jax
import jax.numpy as jnp
from jax import lax
from jax.experimental import pallas as pl
from jax.experimental.pallas import tpu as pltpu

EPS = 1e-5


def fused_kernel(x_ref, s_ref, w_ref, g_ref, b_ref, o_ref, *, inv_r):
    # x_ref: [Cin, Rp]   channel-major activations (zero-padded to lane-dense Rp)
    # s_ref: [1, Cin]    per-input-channel multiplier (x256 squeezed)
    # w_ref: [Ct, Cin]   1x1-conv weight tile (Ct output channels for this grid step)
    # g_ref, b_ref: [Ct, 1]  batchnorm affine params
    # o_ref: [Ct, Rp]
    # Fold the per-channel scale into the (small) weight tile -> no scaled-X temp.
    w_s = w_ref[...] * s_ref[...]                                     # [Ct, Cin]   (VPU)
    # 1x1 conv in channel-major form: Y = W @ X -> [Ct, Rp]            (MXU)
    y = jnp.dot(w_s, x_ref[...], preferred_element_type=jnp.float32)
    # Stage y through the already-resident output tile to shorten vreg live ranges.
    o_ref[...] = y
    yy = o_ref[...]
    # BatchNorm2d training-mode biased batch stats, one pass.  Padded columns of
    # yy are exactly zero (X was zero-padded), so they contribute nothing to the
    # sums; inv_r remains 1/(N*H*W).  Sums done as MXU matvecs (off the XLU).
    ones = jnp.ones((yy.shape[1], 1), dtype=jnp.float32)
    s1 = jnp.dot(yy, ones, preferred_element_type=jnp.float32)        # [Ct, 1]
    s2 = jnp.dot(yy * yy, ones, preferred_element_type=jnp.float32)   # [Ct, 1]
    mean = s1 * inv_r
    var = jnp.maximum(s2 * inv_r - mean * mean, 0.0)                  # guard cancellation
    a = lax.rsqrt(var + EPS) * g_ref[...]                             # folded scale
    c = b_ref[...] - mean * a                                         # folded shift
    o_ref[...] = yy * a + c


def _cout_tile(cout):
    """Cout tile size: split across the 2 TensorCores on v7x-class chips."""
    try:
        kind = jax.devices()[0].device_kind.lower()
    except Exception:
        kind = ""
    n_tc = 2 if "7" in kind else 1  # v5e/v6e have a single TensorCore per chip
    if n_tc > 1 and cout % n_tc == 0 and (cout // n_tc) % 8 == 0:
        return cout // n_tc
    return cout


def fused_mul_conv_bn(x251, x256, conv_w, bn_gamma, bn_beta):
    """x251: [N,Cin,H,W], x256: [N,Cin,1,1], conv_w: [Cout,Cin,1,1]."""
    N, Cin, H, W = x251.shape
    Cout = conv_w.shape[0]
    R = N * H * W

    # Channel-major fast path: with N == 1 the reshape below is a free view of
    # NCHW (no transpose, no extra HBM traffic).
    assert N == 1, "channel-major fast path assumes batch == 1 (as in the source module)"

    # Lane-dense spatial axis: pad R up to a multiple of 128 with zeros.
    Rp = pl.cdiv(R, 128) * 128
    x_cm = x251.reshape(Cin, R).astype(jnp.float32)
    if Rp != R:
        x_cm = jnp.pad(x_cm, ((0, 0), (0, Rp - R)))      # zero pad -> stats unaffected
    scale = x256.reshape(1, Cin).astype(jnp.float32)
    w2d = conv_w.reshape(Cout, Cin).astype(jnp.float32)
    gamma = bn_gamma.reshape(Cout, 1).astype(jnp.float32)
    beta = bn_beta.reshape(Cout, 1).astype(jnp.float32)

    ct = _cout_tile(Cout)
    grid = (Cout // ct,)

    kernel = functools.partial(fused_kernel, inv_r=1.0 / float(R))

    out_cm = pl.pallas_call(
        kernel,
        out_shape=jax.ShapeDtypeStruct((Cout, Rp), jnp.float32),
        grid=grid,
        in_specs=[
            pl.BlockSpec((Cin, Rp), lambda i: (0, 0)),   # X: constant index -> fetched once
            pl.BlockSpec((1, Cin), lambda i: (0, 0)),    # per-channel scale
            pl.BlockSpec((ct, Cin), lambda i: (i, 0)),   # weight tile
            pl.BlockSpec((ct, 1), lambda i: (i, 0)),     # gamma tile
            pl.BlockSpec((ct, 1), lambda i: (i, 0)),     # beta tile
        ],
        out_specs=pl.BlockSpec((ct, Rp), lambda i: (i, 0)),
        compiler_params=pltpu.CompilerParams(dimension_semantics=("parallel",)),
    )(x_cm, scale, w2d, gamma, beta)

    # Drop the zero-padded spatial columns; [Cout, R] -> [N, Cout, H, W] is free for N == 1.
    return out_cm[:, :R].reshape(N, Cout, H, W)


def reference(x251, x256, conv_w, bn_gamma, bn_beta):
    """Plain-JAX NCHW reference mirroring the PyTorch module forward."""
    x = x256 * x251                                                     # [N,Cin,H,W]
    Cout = conv_w.shape[0]
    y = jnp.einsum('oc,nchw->nohw', conv_w.reshape(Cout, -1), x)        # 1x1 conv
    mean = jnp.mean(y, axis=(0, 2, 3), keepdims=True)
    var = jnp.mean((y - mean) ** 2, axis=(0, 2, 3), keepdims=True)
    return ((y - mean) * lax.rsqrt(var + EPS) * bn_gamma.reshape(1, -1, 1, 1)
            + bn_beta.reshape(1, -1, 1, 1))


if __name__ == "__main__":
    key = jax.random.PRNGKey(0)
    k1, k2, k3 = jax.random.split(key, 3)

    N, Cin, Cout, H, W = 1, 672, 160, 14, 14

    x251 = jax.random.normal(k1, (N, Cin, H, W), dtype=jnp.float32)
    x256 = jax.random.normal(k2, (N, Cin, 1, 1), dtype=jnp.float32)

    # Conv2d(672, 160, 1x1, bias=False): weight [Cout, Cin, 1, 1]
    fan_in = Cin
    bound = 1.0 / (fan_in ** 0.5)
    conv_w = jax.random.uniform(k3, (Cout, Cin, 1, 1), dtype=jnp.float32,
                                minval=-bound, maxval=bound)
    # BatchNorm2d(160) default init: weight=1, bias=0
    bn_gamma = jnp.ones((Cout,), dtype=jnp.float32)
    bn_beta = jnp.zeros((Cout,), dtype=jnp.float32)

    out = fused_mul_conv_bn(x251, x256, conv_w, bn_gamma, bn_beta)
    out = jax.block_until_ready(out)

    ref = jax.block_until_ready(reference(x251, x256, conv_w, bn_gamma, bn_beta))
    assert out.shape == (N, Cout, H, W)
    assert jnp.allclose(out, ref, atol=1e-4, rtol=1e-4)

    print("KERNEL_OK")
</pallas_src>

<mosaic_0001>
module attributes {stable_mosaic.version = 11 : i64} {
  func.func @fused_kernel(%arg0: i32, %arg1: memref<672x256xf32, #tpu.memory_space<vmem>>, %arg2: memref<1x672xf32, #tpu.memory_space<vmem>>, %arg3: memref<160x672xf32, #tpu.memory_space<vmem>>, %arg4: memref<160x1xf32, #tpu.memory_space<vmem>>, %arg5: memref<160x1xf32, #tpu.memory_space<vmem>>, %arg6: memref<160x256xf32, #tpu.memory_space<vmem>>) attributes {dimension_semantics = [#tpu.dimension_semantics<parallel>], iteration_bounds = array<i64: 1>, scalar_prefetch = 0 : i64, scratch_operands = 0 : i64, tpu.core_type = #tpu.core_type<tc>, window_params = [{pipeline_mode = #tpu.pipeline_mode<synchronous>, transform_indices = @transform_0, window_bounds = array<i64: 672, 256>}, {pipeline_mode = #tpu.pipeline_mode<synchronous>, transform_indices = @transform_1, window_bounds = array<i64: 1, 672>}, {transform_indices = @transform_2, window_bounds = array<i64: 160, 672>}, {transform_indices = @transform_3, window_bounds = array<i64: 160, 1>}, {transform_indices = @transform_4, window_bounds = array<i64: 160, 1>}, {transform_indices = @transform_5, window_bounds = array<i64: 160, 256>}]} {
    %c0 = arith.constant 0 : index
    %c0_0 = arith.constant 0 : index
    %0 = vector.load %arg3[%c0, %c0_0] : memref<160x672xf32, #tpu.memory_space<vmem>>, vector<160x672xf32>
    %c0_1 = arith.constant 0 : index
    %c0_2 = arith.constant 0 : index
    %1 = vector.load %arg2[%c0_1, %c0_2] : memref<1x672xf32, #tpu.memory_space<vmem>>, vector<1x672xf32>
    %2 = vector.broadcast %1 : vector<1x672xf32> to vector<160x672xf32>
    %3 = arith.mulf %0, %2 : vector<160x672xf32>
    %c0_3 = arith.constant 0 : index
    %c0_4 = arith.constant 0 : index
    %4 = vector.load %arg1[%c0_3, %c0_4] : memref<672x256xf32, #tpu.memory_space<vmem>>, vector<672x256xf32>
    %cst = arith.constant dense<0.000000e+00> : vector<160x256xf32>
    %5 = tpu.matmul %3, %4, %cst {dimension_numbers = #tpu.dot_dimension_numbers<[1], [0], [0], [1], [0, 0, 1, 1], [], []>} : vector<160x672xf32>, vector<672x256xf32>, vector<160x256xf32> -> vector<160x256xf32>
    %c0_5 = arith.constant 0 : index
    %c0_6 = arith.constant 0 : index
    %6 = vector.load %arg6[%c0_5, %c0_6] : memref<160x256xf32, #tpu.memory_space<vmem>>, vector<160x256xf32>
    tpu.vector_store %arg6[%c0_5, %c0_6], %5 {strides = array<i32>} : memref<160x256xf32, #tpu.memory_space<vmem>>, vector<160x256xf32>,
    %c0_7 = arith.constant 0 : index
    %c0_8 = arith.constant 0 : index
    %7 = vector.load %arg6[%c0_7, %c0_8] : memref<160x256xf32, #tpu.memory_space<vmem>>, vector<160x256xf32>
    %cst_9 = arith.constant 1.000000e+00 : f32
    %8 = vector.broadcast %cst_9 : f32 to vector<256x1xf32>
    %cst_10 = arith.constant dense<0.000000e+00> : vector<160x1xf32>
    %9 = tpu.matmul %7, %8, %cst_10 {dimension_numbers = #tpu.dot_dimension_numbers<[1], [0], [0], [1], [0, 0, 1, 1], [], []>} : vector<160x256xf32>, vector<256x1xf32>, vector<160x1xf32> -> vector<160x1xf32>
    %10 = arith.mulf %7, %7 : vector<160x256xf32>
    %cst_11 = arith.constant dense<0.000000e+00> : vector<160x1xf32>
    %11 = tpu.matmul %10, %8, %cst_11 {dimension_numbers = #tpu.dot_dimension_numbers<[1], [0], [0], [1], [0, 0, 1, 1], [], []>} : vector<160x256xf32>, vector<256x1xf32>, vector<160x1xf32> -> vector<160x1xf32>
    %cst_12 = arith.constant 0.00510204071 : f32
    %12 = vector.broadcast %cst_12 : f32 to vector<160x1xf32>
    %13 = arith.mulf %9, %12 : vector<160x1xf32>
    %cst_13 = arith.constant 0.00510204071 : f32
    %14 = vector.broadcast %cst_13 : f32 to vector<160x1xf32>
    %15 = arith.mulf %11, %14 : vector<160x1xf32>
    %16 = arith.mulf %13, %13 : vector<160x1xf32>
    %17 = arith.subf %15, %16 : vector<160x1xf32>
    %cst_14 = arith.constant 0.000000e+00 : f32
    %18 = vector.broadcast %cst_14 : f32 to vector<160x1xf32>
    %19 = arith.maximumf %17, %18 : vector<160x1xf32>
    %cst_15 = arith.constant 9.99999974E-6 : f32
    %20 = vector.broadcast %cst_15 : f32 to vector<160x1xf32>
    %21 = arith.addf %19, %20 : vector<160x1xf32>
    %22 = math.rsqrt %21 : vector<160x1xf32>
    %c0_16 = arith.constant 0 : index
    %c0_17 = arith.constant 0 : index
    %23 = vector.load %arg4[%c0_16, %c0_17] : memref<160x1xf32, #tpu.memory_space<vmem>>, vector<160x1xf32>
    %24 = arith.mulf %22, %23 : vector<160x1xf32>
    %c0_18 = arith.constant 0 : index
    %c0_19 = arith.constant 0 : index
    %25 = vector.load %arg5[%c0_18, %c0_19] : memref<160x1xf32, #tpu.memory_space<vmem>>, vector<160x1xf32>
    %26 = arith.mulf %13, %24 : vector<160x1xf32>
    %27 = arith.subf %25, %26 : vector<160x1xf32>
    %28 = vector.broadcast %24 : vector<160x1xf32> to vector<160x256xf32>
    %29 = arith.mulf %7, %28 : vector<160x256xf32>
    %30 = vector.broadcast %27 : vector<160x1xf32> to vector<160x256xf32>
    %31 = arith.addf %29, %30 : vector<160x256xf32>
    %c0_20 = arith.constant 0 : index
    %c0_21 = arith.constant 0 : index
    %32 = vector.load %arg6[%c0_20, %c0_21] : memref<160x256xf32, #tpu.memory_space<vmem>>, vector<160x256xf32>
    tpu.vector_store %arg6[%c0_20, %c0_21], %31 {strides = array<i32>} : memref<160x256xf32, #tpu.memory_space<vmem>>, vector<160x256xf32>,
    return
  }
  func.func @transform_0(%arg0: i32) -> (i32, i32) {
    %c0_i32 = arith.constant 0 : i32
    %c0_i32_0 = arith.constant 0 : i32
    %c0_i32_1 = arith.constant 0 : i32
    return %c0_i32, %c0_i32_0 : i32, i32
  }
  func.func @transform_1(%arg0: i32) -> (i32, i32) {
    %c0_i32 = arith.constant 0 : i32
    %c0_i32_0 = arith.constant 0 : i32
    %c0_i32_1 = arith.constant 0 : i32
    return %c0_i32, %c0_i32_0 : i32, i32
  }
  func.func @transform_2(%arg0: i32) -> (i32, i32) {
    %c0_i32 = arith.constant 0 : i32
    %c0_i32_0 = arith.constant 0 : i32
    return %arg0, %c0_i32 : i32, i32
  }
  func.func @transform_3(%arg0: i32) -> (i32, i32) {
    %c0_i32 = arith.constant 0 : i32
    %c0_i32_0 = arith.constant 0 : i32
    return %arg0, %c0_i32 : i32, i32
  }
  func.func @transform_4(%arg0: i32) -> (i32, i32) {
    %c0_i32 = arith.constant 0 : i32
    %c0_i32_0 = arith.constant 0 : i32
    return %arg0, %c0_i32 : i32, i32
  }
  func.func @transform_5(%arg0: i32) -> (i32, i32) {
    %c0_i32 = arith.constant 0 : i32
    %c0_i32_0 = arith.constant 0 : i32
    return %arg0, %c0_i32 : i32, i32
  }
}

</mosaic_0001>

<bundles_post_ra>
// kernel: tpu_custom_call.1
= control target key start
LH: loop header
LB: loop body
LE: loop exit
PB: predicated region body
PF: predicated region fallthrough
CT: control target
= control target key end

     0   :  { %10 = vsyncpa [#allocation3], 0  ;;  %s3512_s0 = inlined_call_operand.hbm [shape: f32[672,256], index: 0, kind: input, shape index: {}]   ;;  %s3513_s1 = inlined_call_operand.vmem [shape: f32[1,672], index: 1, kind: input, shape index: {}]   ;;  %s3514_s2 = inlined_call_operand.hbm [shape: f32[160,672], index: 2, kind: input, shape index: {}]   ;;  %s3515_s3 = inlined_call_operand.vmem [shape: f32[160,1], index: 3, kind: input, shape index: {}]   ;;  %s3516_s4 = inlined_call_operand.vmem [shape: f32[160,1], index: 4, kind: input, shape index: {}]   ;;  %s3517_s5 = inlined_call_operand.hbm [shape: f32[160,256], index: 5, kind: output, shape index: {}]  }
   0x1   :  { %11 = vsyncpa [#allocation6], 0 }
   0x2   :  { %12 = vsyncpa [#allocation4], 0  ;;  %s2609_s18 = smov [#allocation2]   ;;  %s2537_s22 = scalar_lea.hbm %s3512_s0, 21504 }
   0x3   :  { %s18_s19 = sshll.u32 %s2609_s18, 4  ;;  %p2538_p0 = scmp.ne.s32.totalorder %s3512_s0, %s2537_s22  ;;  %s19_s19 = int_to_ptr.vmem [resolvable:$true] %s18_s19 }
   0x4   :  { %p2541_p1 = scmp.lt.u32.totalorder %s2537_s22, %s3512_s0 }
   0x6   :  { %p2543_p2 = pnand %p2541_p1, %p2538_p0 }
   0x8   :  { %2546 = shalt.err (!%p2543_p2)
}
   0x9   :  { %s2547_s27 = scalar_lea.vmem %s19_s19, 21504  ;;  %p2552_p4 = scmp.lt.s32.totalorder %s19_s19, %s19_s19 }
   0xa   :  { %p2548_p3 = scmp.ne.s32.totalorder %s19_s19, %s2547_s27  ;;  %p2553_p5 = scmp.lt.s32.totalorder %s2547_s27, %s2547_s27 }
   0xc   :  { %p2554_p6 = por %p2553_p5, %p2552_p4 }
   0xe   :  { %p2555_p7 = pnand %p2554_p6, %p2548_p3 }
  0x10   :  { %2558 = shalt.err (!%p2555_p7)
}
  0x11   :  { %s2610_s28 = smov 256   ;;  %s2611_s29 = smov 16  }
  0x12   :  { %24 = dma.hbm_to_vmem [thread:$0]  %s3512_s0, 21504, %s19_s19, [#allocation3], %s2610_s28, %s2610_s28, %s2611_s29  }
  0x13   :  { %s2612_s7 = smov [#allocation5]   ;;  %s2559_s11 = scalar_lea.hbm %s3514_s2, 15360 }
  0x14   :  { %s32_s8 = sshll.u32 %s2612_s7, 4  ;;  %p2560_p8 = scmp.ne.s32.totalorder %s3514_s2, %s2559_s11  ;;  %s33_s8 = int_to_ptr.vmem [resolvable:$true] %s32_s8 }
  0x15   :  { %p2563_p9 = scmp.lt.u32.totalorder %s2559_s11, %s3514_s2 }
  0x17   :  { %p2565_p10 = pnand %p2563_p9, %p2560_p8 }
  0x19   :  { %2568 = shalt.err (!%p2565_p10)
}
  0x1a   :  { %s2569_s16 = scalar_lea.vmem %s33_s8, 15360  ;;  %p2574_p12 = scmp.lt.s32.totalorder %s33_s8, %s33_s8 }
  0x1b   :  { %p2570_p11 = scmp.ne.s32.totalorder %s33_s8, %s2569_s16  ;;  %p2575_p13 = scmp.lt.s32.totalorder %s2569_s16, %s2569_s16 }
  0x1d   :  { %p2576_p0 = por %p2575_p13, %p2574_p12 }
  0x1f   :  { %p2577_p1 = pnand %p2576_p0, %p2570_p11 }
  0x21   :  { %2580 = shalt.err (!%p2577_p1)
}
  0x22   :  { %s2613_s0 = smov 768   ;;  %s2614_s17 = smov 48  }
  0x23   :  { %38 = dma.hbm_to_vmem [thread:$0]  %s3514_s2, 15360, %s33_s8, [#allocation6], %s2613_s0, %s2613_s0, %s2614_s17  }
  0x24   :  { %2603 = dma.done.wait [#allocation3], 21504  }
  0x25   :  { %2604 = vsyncadd [#allocation3], 4294945792 }
  0x26   :  { %2605 = dma.done.wait [#allocation6], 15360  }
  0x27   :  { %2606 = vsyncadd [#allocation6], 4294951936  ;;  %v322_v0 = vld [vmem:[#allocation2 + $0x8] sm:$0xff]  ;;  %v324_v1 = vld [vmem:[#allocation2 + $0x18] sm:$0xff]  ;;  %v171_v25 = vlaneseq  ;;  %vm489_vm0 = vcmask 261120  }
  0x28   :  { %v321_v2 = vld [vmem:[#allocation2] sm:$0xff]  ;;  %v2153_v3 = vpack.c.bf16 %v324_v1, %v322_v0  ;;  %v323_v4 = vld [vmem:[#allocation2 + $0x10] sm:$0xff]  ;;  %v326_v5 = vld [vmem:[#allocation2 + $0x28] sm:$0xff] }
  0x29   :  { %v328_v6 = vld [vmem:[#allocation2 + $0x38] sm:$0xff]  ;;  %v2155_v7 = vpack.c.bf16 %v323_v4, %v321_v2  ;;  %v325_v9 = vld [vmem:[#allocation2 + $0x20] sm:$0xff]  ;;  %v327_v10 = vld [vmem:[#allocation2 + $0x30] sm:$0xff]  ;;  %v2676_v32 = vshrl.u32 %v171_v25, 7 }
  0x2a   :  { %v2157_v8 = vpack.c.bf16 %v328_v6, %v326_v5  ;;  %v330_v11 = vld [vmem:[#allocation2 + $0x48] sm:$0xff]  ;;  %2154 = vmatprep.subr.bf16.mxu0 %v2153_v3  ;;  %v332_v12 = vld [vmem:[#allocation2 + $0x58] sm:$0xff]  ;;  %v2159_v13 = vpack.c.bf16 %v327_v10, %v325_v9  ;;  %v329_v15 = vld [vmem:[#allocation2 + $0x40] sm:$0xff] }
  0x2b   :  { %2156 = vmatpush1.bf16.msra.mxu0 %v2155_v7  ;;  %v2161_v14 = vpack.c.bf16 %v332_v12, %v330_v11  ;;  %v331_v16 = vld [vmem:[#allocation2 + $0x50] sm:$0xff]  ;;  %v334_v17 = vld [vmem:[#allocation2 + $0x68] sm:$0xff]  ;;  %v336_v18 = vld [vmem:[#allocation2 + $0x78] sm:$0xff]  ;;  %v177_v39 = vsub.s32 1, %v2676_v32  ;;  %v185_v40 = vsub.s32 3, %v2676_v32  ;;  %v181_v41 = vsub.s32 2, %v2676_v32 }
  0x2c   :  { %2158 = vmatprep.subr.bf16.mxu0 %v2157_v8  ;;  %v2163_v19 = vpack.c.bf16 %v331_v16, %v329_v15  ;;  %v2165_v20 = vpack.c.bf16 %v336_v18, %v334_v17  ;;  %v333_v21 = vld [vmem:[#allocation2 + $0x60] sm:$0xff]  ;;  %v335_v22 = vld [vmem:[#allocation2 + $0x70] sm:$0xff]  ;;  %v338_v23 = vld [vmem:[#allocation2 + $0x88] sm:$0xff]  ;;  %v189_v0 = vsub.s32 4, %v2676_v32 }
  0x2d   :  { %v340_v24 = vld [vmem:[#allocation2 + $0x98] sm:$0xff]  ;;  %v2167_v26 = vpack.c.bf16 %v335_v22, %v333_v21  ;;  %v337_v28 = vld [vmem:[#allocation2 + $0x80] sm:$0xff]  ;;  %v339_v29 = vld [vmem:[#allocation2 + $0x90] sm:$0xff] }
  0x2e   :  { %v2169_v27 = vpack.c.bf16 %v340_v24, %v338_v23  ;;  %v342_v30 = vld [vmem:[#allocation2 + $0xa8] sm:$0xff]  ;;  %v344_v31 = vld [vmem:[#allocation2 + $0xb8] sm:$0xff]  ;;  %v2171_v33 = vpack.c.bf16 %v339_v29, %v337_v28  ;;  %v341_v35 = vld [vmem:[#allocation2 + $0xa0] sm:$0xff] }
  0x2f   :  { %2160 = vmatpush1.bf16.msra.mxu0 %v2159_v13  ;;  %v2173_v34 = vpack.c.bf16 %v344_v31, %v342_v30  ;;  %v343_v36 = vld [vmem:[#allocation2 + $0xb0] sm:$0xff]  ;;  %v346_v37 = vld [vmem:[#allocation2 + $0xc8] sm:$0xff]  ;;  %v348_v38 = vld [vmem:[#allocation2 + $0xd8] sm:$0xff] }
  0x30   :  { %2162 = vmatprep.subr.bf16.mxu0 %v2161_v14  ;;  %v2175_v42 = vpack.c.bf16 %v343_v36, %v341_v35  ;;  %v345_v43 = vld [vmem:[#allocation2 + $0xc0] sm:$0xff]  ;;  %v2177_v44 = vpack.c.bf16 %v348_v38, %v346_v37  ;;  %v347_v45 = vld [vmem:[#allocation2 + $0xd0] sm:$0xff]  ;;  %v50_v46 = vld [vmem:[#allocation5 + $0x8] sm:$0xff] }
  0x31   :  { %v2684_v47 = vld [vmem:[%s3513_s1] sm:$0x3f]  ;;  %v350_v48 = vld [vmem:[#allocation2 + $0xe8] sm:$0xff]  ;;  %v352_v49 = vld [vmem:[#allocation2 + $0xf8] sm:$0xff]  ;;  %v2179_v53 = vpack.c.bf16 %v347_v45, %v345_v43 }
  0x32   :  { %v2687_v50 = vrot.slane %v2684_v47, %v177_v39  ;;  %v2690_v51 = vrot.slane %v2684_v47, %v185_v40  ;;  %v2693_v52 = vrot.slane %v2684_v47, %v181_v41  ;;  %v2181_v55 = vpack.c.bf16 %v352_v49, %v350_v48  ;;  %v349_v56 = vld [vmem:[#allocation2 + $0xe0] sm:$0xff]  ;;  %v351_v57 = vld [vmem:[#allocation2 + $0xf0] sm:$0xff]  ;;  %v354_v58 = vld [vmem:[#allocation2 + $0x108] sm:$0xff] }
  0x33   :  { %2164 = vmatpush1.bf16.msra.mxu0 %v2163_v19  ;;  %v356_v59 = vld [vmem:[#allocation2 + $0x118] sm:$0xff]  ;;  %v2183_v60 = vpack.c.bf16 %v351_v57, %v349_v56  ;;  %v353_v62 = vld [vmem:[#allocation2 + $0x100] sm:$0xff]  ;;  %v355_v63 = vld [vmem:[#allocation2 + $0x110] sm:$0xff]  ;;  %v2698_v3 = vrot.slane %v2684_v47, %v189_v0 }
  0x34   :  { %2166 = vmatprep.subr.bf16.mxu0 %v2165_v20  ;;  %v202_v54 = vmul.f32 %v2687_v50, %v50_v46  ;;  %v2185_v61 = vpack.c.bf16 %v356_v59, %v354_v58  ;;  %v358_v1 = vld [vmem:[#allocation2 + $0x128] sm:$0xff]  ;;  %v360_v2 = vld [vmem:[#allocation2 + $0x138] sm:$0xff]  ;;  %v2187_v4 = vpack.c.bf16 %v355_v63, %v353_v62  ;;  %v357_v6 = vld [vmem:[#allocation2 + $0x120] sm:$0xff]  ;;  %v173_v62 = vsub.s32 0, %v2676_v32 }
  0x35   :  { %v2189_v5 = vpack.c.bf16 %v360_v2, %v358_v1  ;;  %v359_v7 = vld [vmem:[#allocation2 + $0x130] sm:$0xff]  ;;  %v362_v8 = vld [vmem:[#allocation2 + $0x148] sm:$0xff]  ;;  %v364_v9 = vld [vmem:[#allocation2 + $0x158] sm:$0xff] }
  0x36   :  { %614 = vmatprep.mubr.f32.mxu0 %v202_v54  ;;  %v2191_v10 = vpack.c.bf16 %v359_v7, %v357_v6  ;;  %v2193_v11 = vpack.c.bf16 %v364_v9, %v362_v8  ;;  %v361_v12 = vld [vmem:[#allocation2 + $0x140] sm:$0xff]  ;;  %v363_v13 = vld [vmem:[#allocation2 + $0x150] sm:$0xff]  ;;  %v366_v14 = vld [vmem:[#allocation2 + $0x168] sm:$0xff] }
  0x37   :  { %2168 = vmatpush1.bf16.msra.mxu0 %v2167_v26  ;;  %v368_v15 = vld [vmem:[#allocation2 + $0x178] sm:$0xff]  ;;  %v2195_v16 = vpack.c.bf16 %v363_v13, %v361_v12  ;;  %v365_v18 = vld [vmem:[#allocation2 + $0x160] sm:$0xff]  ;;  %v367_v19 = vld [vmem:[#allocation2 + $0x170] sm:$0xff]  ;;  %v2721_v12 = vrot.slane %v2684_v47, %v173_v62 }
  0x38   :  { %2170 = vmatprep.subr.bf16.mxu0 %v2169_v27  ;;  %v2197_v17 = vpack.c.bf16 %v368_v15, %v366_v14  ;;  %v370_v20 = vld [vmem:[#allocation2 + $0x188] sm:$0xff]  ;;  %v372_v21 = vld [vmem:[#allocation2 + $0x198] sm:$0xff]  ;;  %v2199_v22 = vpack.c.bf16 %v367_v19, %v365_v18  ;;  %v369_v24 = vld [vmem:[#allocation2 + $0x180] sm:$0xff] }
  0x39   :  { %v2201_v23 = vpack.c.bf16 %v372_v21, %v370_v20  ;;  %v371_v25 = vld [vmem:[#allocation2 + $0x190] sm:$0xff]  ;;  %v374_v26 = vld [vmem:[#allocation2 + $0x1a8] sm:$0xff]  ;;  %v376_v27 = vld [vmem:[#allocation2 + $0x1b8] sm:$0xff] }
  0x3a   :  { %v450_v28 = vld [vmem:[#allocation2 + $0x408] sm:$0xff]  ;;  %v2203_v29 = vpack.c.bf16 %v371_v25, %v369_v24  ;;  %v452_v30 = vld [vmem:[#allocation2 + $0x418] sm:$0xff]  ;;  %v449_v31 = vld [vmem:[#allocation2 + $0x400] sm:$0xff] }
  0x3b   :  { %2172 = vmatpush1.bf16.msra.mxu0 %v2171_v33  ;;  %v451_v33 = vld [vmem:[#allocation2 + $0x410] sm:$0xff]  ;;  %v373_v35 = vld [vmem:[#allocation2 + $0x1a0] sm:$0xff]  ;;  %v378_v37 = vld [vmem:[#allocation2 + $0x1c8] sm:$0xff]  ;;  %v2700_v38 = vpack.c.bf16 %v452_v30, %v450_v28 }
  0x3c   :  { %2174 = vmatprep.subr.bf16.mxu0 %v2173_v34  ;;  %v2205_v34 = vpack.c.bf16 %v376_v27, %v374_v26  ;;  %v375_v36 = vld [vmem:[#allocation2 + $0x1b0] sm:$0xff]  ;;  %v2702_v39 = vpack.c.bf16 %v451_v33, %v449_v31  ;;  %v380_v40 = vld [vmem:[#allocation2 + $0x1d8] sm:$0xff]  ;;  %v454_v41 = vld [vmem:[#allocation2 + $0x428] sm:$0xff] }
  0x3d   :  { %2385 = vmatprep.subr.bf16.mxu1 %v2700_v38  ;;  %v2207_v45 = vpack.c.bf16 %v375_v36, %v373_v35  ;;  %v377_v46 = vld [vmem:[#allocation2 + $0x1c0] sm:$0xff]  ;;  %v379_v48 = vld [vmem:[#allocation2 + $0x1d0] sm:$0xff]  ;;  %v382_v54 = vld [vmem:[#allocation2 + $0x1e8] sm:$0xff] }
  0x3e   :  { %2395 = vmatpush1.bf16.msra.mxu1 %v2702_v39  ;;  %v455_v49 = vld [vmem:[#allocation2 + $0x430] sm:$0xff]  ;;  %v458_v56 = vld [vmem:[#allocation2 + $0x448] sm:$0xff]  ;;  %v460_v57 = vld [vmem:[#allocation2 + $0x458] sm:$0xff]  ;;  %v2211_v63 = vpack.c.bf16 %v379_v48, %v377_v46 }
  0x3f   :  { %2176 = vmatpush1.bf16.msra.mxu0 %v2175_v42  ;;  %v456_v42 = vld [vmem:[#allocation2 + $0x438] sm:$0xff]  ;;  %v2711_v59 = vpack.c.bf16 %v460_v57, %v458_v56  ;;  %v381_v0 = vld [vmem:[#allocation2 + $0x1e0] sm:$0xff]  ;;  %v462_v2 = vld [vmem:[#allocation2 + $0x468] sm:$0xff] }
  0x40   :  { %2178 = vmatprep.subr.bf16.mxu0 %v2177_v44  ;;  %v2705_v43 = vpack.c.bf16 %v456_v42, %v454_v41  ;;  %v453_v44 = vld [vmem:[#allocation2 + $0x420] sm:$0xff]  ;;  %v384_v58 = vld [vmem:[#allocation2 + $0x1f8] sm:$0xff]  ;;  %v383_v6 = vld [vmem:[#allocation2 + $0x1f0] sm:$0xff]  ;;  %v193_v42 = vsub.s32 5, %v2676_v32 }
  0x41   :  { %v461_v8 = vld [vmem:[#allocation2 + $0x460] sm:$0xff]  ;;  %v463_v9 = vld [vmem:[#allocation2 + $0x470] sm:$0xff]  ;;  %v466_v13 = vld [vmem:[#allocation2 + $0x488] sm:$0xff]  ;;  %v2215_v14 = vpack.c.bf16 %v383_v6, %v381_v0 }
  0x42   :  { %2386 = vmatprep.subr.bf16.mxu1 %v2705_v43  ;;  %v49_v15 = vld [vmem:[#allocation5] sm:$0xff]  ;;  %v468_v18 = vld [vmem:[#allocation2 + $0x498] sm:$0xff]  ;;  %v387_v20 = vld [vmem:[#allocation2 + $0x210] sm:$0xff] }
  0x43   :  { %2180 = vmatpush1.bf16.msra.mxu0 %v2179_v53  ;;  %v2209_v53 = vpack.c.bf16 %v380_v40, %v378_v37  ;;  %v56_v21 = vld [vmem:[#allocation5 + $0x38] sm:$0xff]  ;;  %v465_v25 = vld [vmem:[#allocation2 + $0x480] sm:$0xff]  ;;  %v467_v26 = vld [vmem:[#allocation2 + $0x490] sm:$0xff]  ;;  %v201_v27 = vmul.f32 %v2721_v12, %v49_v15 }
  0x44   :  { %2182 = vmatprep.subr.bf16.mxu0 %v2181_v55  ;;  %v2709_v55 = vpack.c.bf16 %v455_v49, %v453_v44  ;;  %v392_v24 = vld [vmem:[#allocation2 + $0x238] sm:$0xff]  ;;  %v470_v28 = vld [vmem:[#allocation2 + $0x4a8] sm:$0xff]  ;;  %v208_v31 = vmul.f32 %v2687_v50, %v56_v21  ;;  %v55_v33 = vld [vmem:[#allocation5 + $0x30] sm:$0xff]  ;;  %v2733_v41 = vpack.c.bf16 %v467_v26, %v465_v25 }
  0x45   :  { %v391_v36 = vld [vmem:[#allocation2 + $0x230] sm:$0xff]  ;;  %v62_v37 = vld [vmem:[#allocation5 + $0x68] sm:$0xff]  ;;  %v396_v44 = vld [vmem:[#allocation2 + $0x258] sm:$0xff]  ;;  %v207_v49 = vmul.f32 %v2721_v12, %v55_v33 }
  0x46   :  { %2396 = vmatpush1.bf16.msra.mxu1 %v2709_v55  ;;  %v394_v40 = vld [vmem:[#allocation2 + $0x248] sm:$0xff]  ;;  %v469_v46 = vld [vmem:[#allocation2 + $0x4a0] sm:$0xff]  ;;  %v471_v48 = vld [vmem:[#allocation2 + $0x4b0] sm:$0xff]  ;;  %v214_v57 = vmul.f32 %v2687_v50, %v62_v37 }
  0x47   :  { %2184 = vmatpush1.bf16.msra.mxu0 %v2183_v60  ;;  %v457_v60 = vld [vmem:[#allocation2 + $0x440] sm:$0xff]  ;;  %2387 = vmatprep.subr.bf16.mxu1 %v2711_v59  ;;  %v395_v62 = vld [vmem:[#allocation2 + $0x250] sm:$0xff]  ;;  %v2741_v0 = vpack.c.bf16 %v471_v48, %v469_v46  ;;  %v402_v21 = vld [vmem:[#allocation2 + $0x288] sm:$0xff] }
  0x48   :  { %2186 = vmatprep.subr.bf16.mxu0 %v2185_v61  ;;  %v459_v61 = vld [vmem:[#allocation2 + $0x450] sm:$0xff]  ;;  %v393_v32 = vld [vmem:[#allocation2 + $0x240] sm:$0xff]  ;;  %v404_v25 = vld [vmem:[#allocation2 + $0x298] sm:$0xff] }
  0x49   :  { %v2715_v1 = vpack.c.bf16 %v459_v61, %v457_v60  ;;  %v68_v60 = vld [vmem:[#allocation5 + $0x98] sm:$0xff]  ;;  %v2225_v61 = vpack.c.bf16 %v396_v44, %v394_v40  ;;  %v473_v6 = vld [vmem:[#allocation2 + $0x4c0] sm:$0xff]  ;;  %v67_v15 = vld [vmem:[#allocation5 + $0x90] sm:$0xff]  ;;  %v2233_v37 = vpack.c.bf16 %v404_v25, %v402_v21 }
  0x4a   :  { %v401_v40 = vld [vmem:[#allocation2 + $0x280] sm:$0xff]  ;;  %v406_v44 = vld [vmem:[#allocation2 + $0x2a8] sm:$0xff]  ;;  %v408_v48 = vld [vmem:[#allocation2 + $0x2b8] sm:$0xff] }
  0x4b   :  { %2188 = vmatpush1.bf16.msra.mxu0 %v2187_v4  ;;  %v464_v4 = vld [vmem:[#allocation2 + $0x478] sm:$0xff]  ;;  %2397 = vmatpush1.bf16.msra.mxu1 %v2715_v1  ;;  %v409_v21 = vld [vmem:[#allocation2 + $0x2c0] sm:$0xff] }
  0x4c   :  { %2190 = vmatprep.subr.bf16.mxu0 %v2189_v5  ;;  %v2213_v5 = vpack.c.bf16 %v384_v58, %v382_v54  ;;  %v2718_v7 = vpack.c.bf16 %v464_v4, %v462_v2  ;;  %v476_v54 = vld [vmem:[#allocation2 + $0x4d8] sm:$0xff]  ;;  %v61_v58 = vld [vmem:[#allocation5 + $0x60] sm:$0xff]  ;;  %v2744_v2 = vrot.slane %v2684_v47, %v193_v42  ;;  %v74_v47 = vld [vmem:[#allocation5 + $0xc8] sm:$0xff] }
  0x4d   :  { %v400_v4 = vld [vmem:[#allocation2 + $0x278] sm:$0xff]  ;;  %v226_v33 = vmul.f32 %v2687_v50, %v74_v47  ;;  %v403_v42 = vld [vmem:[#allocation2 + $0x290] sm:$0xff] }
  0x4e   :  { %2388 = vmatprep.subr.bf16.mxu1 %v2718_v7 }
  0x4f   :  { %2192 = vmatpush1.bf16.msra.mxu0 %v2191_v10  ;;  %v386_v10 = vld [vmem:[#allocation2 + $0x208] sm:$0xff] }
  0x50   :  { %2194 = vmatprep.subr.bf16.mxu0 %v2193_v11  ;;  %v388_v11 = vld [vmem:[#allocation2 + $0x218] sm:$0xff] }
  0x51   :  { %v2217_v19 = vpack.c.bf16 %v388_v11, %v386_v10  ;;  %v478_v10 = vld [vmem:[#allocation2 + $0x4e8] sm:$0xff]  ;;  %v480_v11 = vld [vmem:[#allocation2 + $0x4f8] sm:$0xff] }
  0x52   :  { %v2756_v26 = vpack.c.bf16 %v480_v11, %v478_v10  ;;  %v412_v10 = vld [vmem:[#allocation2 + $0x2d8] sm:$0xff] }
  0x53   :  { %2196 = vmatpush1.bf16.msra.mxu0 %v2195_v16  ;;  %v385_v16 = vld [vmem:[#allocation2 + $0x200] sm:$0xff] }
  0x54   :  { %2198 = vmatprep.subr.bf16.mxu0 %v2197_v17  ;;  %v2724_v17 = vpack.c.bf16 %v463_v9, %v461_v8  ;;  %v2219_v30 = vpack.c.bf16 %v387_v20, %v385_v16  ;;  %v475_v8 = vld [vmem:[#allocation2 + $0x4d0] sm:$0xff]  ;;  %v213_v9 = vmul.f32 %v2721_v12, %v61_v58  ;;  %v78_v16 = vld [vmem:[#allocation5 + $0xe8] sm:$0xff]  ;;  %v488_v58 = vld [vmem:[#allocation2 + $0x538] sm:$0xff] }
  0x55   :  { %v399_v20 = vld [vmem:[#allocation2 + $0x270] sm:$0xff] }
  0x56   :  { %2398 = vmatpush1.bf16.msra.mxu1 %v2724_v17 }
  0x57   :  { %2200 = vmatpush1.bf16.msra.mxu0 %v2199_v22  ;;  %v390_v22 = vld [vmem:[#allocation2 + $0x228] sm:$0xff] }
  0x58   :  { %2202 = vmatprep.subr.bf16.mxu0 %v2201_v23  ;;  %v2727_v23 = vpack.c.bf16 %v468_v18, %v466_v13  ;;  %v2221_v35 = vpack.c.bf16 %v392_v24, %v390_v22  ;;  %v220_v13 = vmul.f32 %v2687_v50, %v68_v60  ;;  %v2752_v22 = vpack.c.bf16 %v475_v8, %v473_v6  ;;  %v407_v6 = vld [vmem:[#allocation2 + $0x2b0] sm:$0xff]  ;;  %v410_v8 = vld [vmem:[#allocation2 + $0x2c8] sm:$0xff] }
  0x59   :  { %v230_v24 = vmul.f32 %v2744_v2, %v78_v16  ;;  %v85_v16 = vld [vmem:[#allocation5 + $0x120] sm:$0xff] }
  0x5a   :  { %2389 = vmatprep.subr.bf16.mxu1 %v2727_v23 }
  0x5b   :  { %2204 = vmatpush1.bf16.msra.mxu0 %v2203_v29  ;;  %v472_v29 = vld [vmem:[#allocation2 + $0x4b8] sm:$0xff]  ;;  %2399 = vmatpush1.bf16.msra.mxu1 %v2733_v41 }
  0x5c   :  { %2206 = vmatprep.subr.bf16.mxu0 %v2205_v34  ;;  %v389_v34 = vld [vmem:[#allocation2 + $0x220] sm:$0xff]  ;;  %2137 = vmatprep.mubr.msk.f32.mxu1 %vm489_vm0, %v230_v24  ;;  %v411_v24 = vld [vmem:[#allocation2 + $0x2d0] sm:$0xff] }
  0x5d   :  { %v2223_v56 = vpack.c.bf16 %v391_v36, %v389_v34  ;;  %v73_v34 = vld [vmem:[#allocation5 + $0xc0] sm:$0xff]  ;;  %v80_v36 = vld [vmem:[#allocation5 + $0xf8] sm:$0xff] }
  0x5e   :  { %v232_v60 = vmul.f32 %v2687_v50, %v80_v36  ;;  %v98_v36 = vld [vmem:[#allocation5 + $0x188] sm:$0xff] }
  0x5f   :  { %2208 = vmatpush1.bf16.msra.mxu0 %v2207_v45  ;;  %v2736_v45 = vpack.c.bf16 %v472_v29, %v470_v28  ;;  %v479_v28 = vld [vmem:[#allocation2 + $0x4f0] sm:$0xff]  ;;  %v219_v29 = vmul.f32 %v2721_v12, %v67_v15 }
  0x60   :  { %2210 = vmatprep.subr.bf16.mxu0 %v2209_v53  ;;  %v474_v53 = vld [vmem:[#allocation2 + $0x4c8] sm:$0xff] }
  0x61   :  { %2390 = vmatprep.subr.bf16.mxu1 %v2736_v45 }
  0x62   :  { %2400 = vmatpush1.bf16.msra.mxu1 %v2741_v0 }
  0x63   :  { %2212 = vmatpush1.bf16.msra.mxu0 %v2211_v63  ;;  %v398_v63 = vld [vmem:[#allocation2 + $0x268] sm:$0xff] }
  0x64   :  { %2214 = vmatprep.subr.bf16.mxu0 %v2213_v5  ;;  %v2747_v5 = vpack.c.bf16 %v476_v54, %v474_v53  ;;  %v2229_v18 = vpack.c.bf16 %v400_v4, %v398_v63  ;;  %v481_v53 = vld [vmem:[#allocation2 + $0x500] sm:$0xff]  ;;  %v483_v54 = vld [vmem:[#allocation2 + $0x510] sm:$0xff]  ;;  %v2237_v63 = vpack.c.bf16 %v408_v48, %v406_v44  ;;  %v418_v48 = vld [vmem:[#allocation2 + $0x308] sm:$0xff] }
  0x65   :  { %v405_v4 = vld [vmem:[#allocation2 + $0x2a0] sm:$0xff] }
  0x66   :  { %2391 = vmatprep.subr.bf16.mxu1 %v2747_v5 }
  0x67   :  { %2216 = vmatpush1.bf16.msra.mxu0 %v2215_v14  ;;  %v2227_v14 = vpack.c.bf16 %v395_v62, %v393_v32  ;;  %2401 = vmatpush1.bf16.msra.mxu1 %v2752_v22  ;;  %v2235_v32 = vpack.c.bf16 %v403_v42, %v401_v40  ;;  %v86_v62 = vld [vmem:[#allocation5 + $0x128] sm:$0xff]  ;;  %v413_v40 = vld [vmem:[#allocation2 + $0x2e0] sm:$0xff]  ;;  %v415_v42 = vld [vmem:[#allocation2 + $0x2f0] sm:$0xff] }
  0x68   :  { %2218 = vmatprep.subr.bf16.mxu0 %v2217_v19  ;;  %v397_v19 = vld [vmem:[#allocation2 + $0x260] sm:$0xff]  ;;  %2392 = vmatprep.subr.bf16.mxu1 %v2756_v26  ;;  %v238_v47 = vmul.f32 %v2687_v50, %v86_v62  ;;  %v104_v62 = vld [vmem:[#allocation5 + $0x1b8] sm:$0xff] }
  0x6a   :  { %615 = vmatmul.mubr.f32.vlgmr.msra.gmra.mrb[0].mxu0 %v201_v27  ;;  %v477_v27 = vld [vmem:[#allocation2 + $0x4e0] sm:$0xff] }
  0x6b   :  { %2220 = vmatpush1.bf16.msra.mxu0 %v2219_v30  ;;  %620 = vmatprep.mubr.f32.mxu0 %v208_v31  ;;  %v482_v30 = vld [vmem:[#allocation2 + $0x508] sm:$0xff]  ;;  %v484_v31 = vld [vmem:[#allocation2 + $0x518] sm:$0xff]  ;;  %v2762_v46 = vpack.c.bf16 %v479_v28, %v477_v27 }
  0x6c   :  { %2222 = vmatprep.subr.bf16.mxu0 %v2221_v35  ;;  %v2231_v35 = vpack.c.bf16 %v399_v20, %v397_v19  ;;  %v92_v19 = vld [vmem:[#allocation5 + $0x158] sm:$0xff]  ;;  %v2241_v20 = vpack.c.bf16 %v412_v10, %v410_v8  ;;  %v414_v27 = vld [vmem:[#allocation2 + $0x2e8] sm:$0xff] }
  0x6d   :  { %2402 = vmatpush1.bf16.msra.mxu1 %v2762_v46  ;;  %v416_v28 = vld [vmem:[#allocation2 + $0x2f8] sm:$0xff]  ;;  %v422_v10 = vld [vmem:[#allocation2 + $0x328] sm:$0xff] }
  0x6e   :  { %621 = vmatmul.mubr.f32.gmra.mrb[2].mxu0 %v207_v49  ;;  %v2765_v49 = vpack.c.bf16 %v484_v31, %v482_v30  ;;  %v237_v30 = vmul.f32 %v2721_v12, %v85_v16  ;;  %v84_v31 = vld [vmem:[#allocation5 + $0x118] sm:$0xff] }
  0x6f   :  { %2224 = vmatpush1.bf16.msra.mxu0 %v2223_v56  ;;  %626 = vmatprep.mubr.f32.mxu0 %v214_v57  ;;  %v225_v56 = vmul.f32 %v2721_v12, %v73_v34  ;;  %v486_v57 = vld [vmem:[#allocation2 + $0x528] sm:$0xff]  ;;  %v91_v34 = vld [vmem:[#allocation5 + $0x150] sm:$0xff]  ;;  %v96_v16 = vld [vmem:[#allocation5 + $0x178] sm:$0xff] }
  0x70   :  { %2226 = vmatprep.subr.bf16.mxu0 %v2225_v61  ;;  %v79_v61 = vld [vmem:[#allocation5 + $0xf0] sm:$0xff]  ;;  %2393 = vmatprep.subr.bf16.mxu1 %v2765_v49  ;;  %v2773_v11 = vpack.c.bf16 %v488_v58, %v486_v57  ;;  %v243_v57 = vmul.f32 %v2721_v12, %v91_v34  ;;  %v90_v58 = vld [vmem:[#allocation5 + $0x148] sm:$0xff] }
  0x71   :  { %v231_v15 = vmul.f32 %v2721_v12, %v79_v61  ;;  %v97_v61 = vld [vmem:[#allocation5 + $0x180] sm:$0xff]  ;;  %v95_v34 = vld [vmem:[#allocation5 + $0x170] sm:$0xff] }
  0x72   :  { %627 = vmatmul.mubr.f32.gmra.mrb[4].mxu0 %v213_v9  ;;  %v2770_v9 = vpack.c.bf16 %v483_v54, %v481_v53  ;;  %v420_v53 = vld [vmem:[#allocation2 + $0x318] sm:$0xff]  ;;  %v236_v54 = vmul.f32 %v2744_v2, %v84_v31 }
  0x73   :  { %632 = vmatprep.mubr.f32.mxu0 %v220_v13  ;;  %2228 = vmatpush1.bf16.msra.mxu0 %v2227_v14  ;;  %v485_v13 = vld [vmem:[#allocation2 + $0x520] sm:$0xff]  ;;  %v487_v14 = vld [vmem:[#allocation2 + $0x530] sm:$0xff]  ;;  %v428_v31 = vld [vmem:[#allocation2 + $0x358] sm:$0xff] }
  0x74   :  { %2230 = vmatprep.subr.bf16.mxu0 %v2229_v18  ;;  %v2239_v18 = vpack.c.bf16 %v407_v6, %v405_v4  ;;  %2403 = vmatpush1.bf16.msra.mxu1 %v2770_v9  ;;  %v2778_v25 = vpack.c.bf16 %v487_v14, %v485_v13  ;;  %v417_v4 = vld [vmem:[#allocation2 + $0x300] sm:$0xff]  ;;  %v419_v6 = vld [vmem:[#allocation2 + $0x310] sm:$0xff]  ;;  %v424_v13 = vld [vmem:[#allocation2 + $0x338] sm:$0xff]  ;;  %v242_v14 = vmul.f32 %v2744_v2, %v90_v58 }
  0x75   :  { %2394 = vmatprep.subr.bf16.mxu1 %v2773_v11  ;;  %v432_v58 = vld [vmem:[#allocation2 + $0x378] sm:$0xff] }
  0x76   :  { %633 = vmatmul.mubr.f32.gmra.mrb[6].mxu0 %v219_v29  ;;  %v77_v29 = vld [vmem:[#allocation5 + $0xe0] sm:$0xff] }
  0x77   :  { %638 = vmatprep.mubr.f32.mxu0 %v226_v33  ;;  %2232 = vmatpush1.bf16.msra.mxu0 %v2231_v35  ;;  %v244_v33 = vmul.f32 %v2687_v50, %v92_v19  ;;  %v2243_v35 = vpack.c.bf16 %v411_v24, %v409_v21  ;;  %v229_v44 = vmul.f32 %v2698_v3, %v77_v29  ;;  %v103_v19 = vld [vmem:[#allocation5 + $0x1b0] sm:$0xff]  ;;  %v110_v21 = vld [vmem:[#allocation5 + $0x1e8] sm:$0xff] }
  0x78   :  { %2234 = vmatprep.subr.bf16.mxu0 %v2233_v37  ;;  %v2245_v37 = vpack.c.bf16 %v416_v28, %v414_v27  ;;  %2404 = vmatpush1.bf16.msra.mxu1 %v2778_v25  ;;  %v2253_v24 = vpack.c.bf16 %v424_v13, %v422_v10  ;;  %v421_v27 = vld [vmem:[#allocation2 + $0x320] sm:$0xff]  ;;  %v423_v28 = vld [vmem:[#allocation2 + $0x330] sm:$0xff] }
  0x79   :  { %v429_v13 = vld [vmem:[#allocation2 + $0x360] sm:$0xff] }
  0x7a   :  { %639 = vmatmul.mubr.f32.gmra.mrb[8].mxu0 %v225_v56  ;;  %v83_v56 = vld [vmem:[#allocation5 + $0x110] sm:$0xff] }
  0x7b   :  { %644 = vmatprep.mubr.f32.mxu0 %v232_v60  ;;  %2236 = vmatpush1.bf16.msra.mxu0 %v2235_v32  ;;  %v250_v60 = vmul.f32 %v2687_v50, %v98_v36  ;;  %v2247_v32 = vpack.c.bf16 %v415_v42, %v413_v40  ;;  %v235_v8 = vmul.f32 %v2698_v3, %v83_v56  ;;  %v102_v36 = vld [vmem:[#allocation5 + $0x1a8] sm:$0xff]  ;;  %v109_v40 = vld [vmem:[#allocation5 + $0x1e0] sm:$0xff] }
  0x7c   :  { %2238 = vmatprep.subr.bf16.mxu0 %v2237_v63  ;;  %v2249_v63 = vpack.c.bf16 %v420_v53, %v418_v48  ;;  %1009 = vmatmul.mubr.f32.vlgmr.msra.gmra.mrb[0].mxu1 %v229_v44  ;;  %v2255_v42 = vpack.c.bf16 %v423_v28, %v421_v27  ;;  %v116_v44 = vld [vmem:[#allocation5 + $0x218] sm:$0xff]  ;;  %v425_v53 = vld [vmem:[#allocation2 + $0x340] sm:$0xff]  ;;  %v247_v56 = vmul.f32 %v2698_v3, %v95_v34 }
  0x7d   :  { %2138 = vmatprep.mubr.msk.f32.mxu1 %vm489_vm0, %v236_v54  ;;  %v427_v54 = vld [vmem:[#allocation2 + $0x350] sm:$0xff]  ;;  %v121_v27 = vld [vmem:[#allocation5 + $0x240] sm:$0xff] }
  0x7e   :  { %645 = vmatmul.mubr.f32.gmra.mrb[10].mxu0 %v231_v15  ;;  %v89_v15 = vld [vmem:[#allocation5 + $0x140] sm:$0xff] }
  0x7f   :  { %650 = vmatprep.mubr.f32.mxu0 %v238_v47  ;;  %2240 = vmatpush1.bf16.msra.mxu0 %v2239_v18  ;;  %v249_v47 = vmul.f32 %v2721_v12, %v97_v61  ;;  %v256_v18 = vmul.f32 %v2687_v50, %v104_v62  ;;  %v241_v29 = vmul.f32 %v2698_v3, %v89_v15  ;;  %v101_v61 = vld [vmem:[#allocation5 + $0x1a0] sm:$0xff]  ;;  %v108_v62 = vld [vmem:[#allocation5 + $0x1d8] sm:$0xff] }
  0x80   :  { %2242 = vmatprep.subr.bf16.mxu0 %v2241_v20  ;;  %v2251_v20 = vpack.c.bf16 %v419_v6, %v417_v4  ;;  %1015 = vmatmul.mubr.f32.gmra.mrb[2].mxu1 %v235_v8  ;;  %v115_v4 = vld [vmem:[#allocation5 + $0x210] sm:$0xff]  ;;  %v2259_v6 = vpack.c.bf16 %v427_v54, %v425_v53  ;;  %v122_v8 = vld [vmem:[#allocation5 + $0x248] sm:$0xff]  ;;  %v253_v15 = vmul.f32 %v2698_v3, %v101_v61 }
  0x81   :  { %2139 = vmatprep.mubr.msk.f32.mxu1 %vm489_vm0, %v242_v14  ;;  %v431_v14 = vld [vmem:[#allocation2 + $0x370] sm:$0xff] }
  0x82   :  { %651 = vmatmul.mubr.f32.gmra.mrb[12].mxu0 %v237_v30  ;;  %v426_v30 = vld [vmem:[#allocation2 + $0x348] sm:$0xff]  ;;  %v2263_v28 = vpack.c.bf16 %v431_v14, %v429_v13  ;;  %v127_v53 = vld [vmem:[#allocation5 + $0x270] sm:$0xff]  ;;  %v133_v13 = vld [vmem:[#allocation5 + $0x2a0] sm:$0xff] }
  0x83   :  { %656 = vmatprep.mubr.f32.mxu0 %v244_v33  ;;  %2244 = vmatpush1.bf16.msra.mxu0 %v2243_v35  ;;  %v248_v33 = vmul.f32 %v2744_v2, %v96_v16  ;;  %v255_v35 = vmul.f32 %v2721_v12, %v103_v19  ;;  %v2257_v48 = vpack.c.bf16 %v428_v31, %v426_v30  ;;  %v436_v16 = vld [vmem:[#allocation2 + $0x398] sm:$0xff]  ;;  %v107_v19 = vld [vmem:[#allocation5 + $0x1d0] sm:$0xff]  ;;  %v433_v31 = vld [vmem:[#allocation2 + $0x380] sm:$0xff] }
  0x84   :  { %2246 = vmatprep.subr.bf16.mxu0 %v2245_v37  ;;  %v262_v37 = vmul.f32 %v2687_v50, %v110_v21  ;;  %1021 = vmatmul.mubr.f32.gmra.mrb[4].mxu1 %v241_v29  ;;  %v114_v21 = vld [vmem:[#allocation5 + $0x208] sm:$0xff]  ;;  %v128_v29 = vld [vmem:[#allocation5 + $0x278] sm:$0xff]  ;;  %v259_v34 = vmul.f32 %v2698_v3, %v107_v19 }
  0x85   :  { %2140 = vmatprep.mubr.msk.f32.mxu1 %vm489_vm0, %v248_v33  ;;  %v435_v33 = vld [vmem:[#allocation2 + $0x390] sm:$0xff] }
  0x86   :  { %657 = vmatmul.mubr.f32.gmra.mrb[14].mxu0 %v243_v57  ;;  %v430_v57 = vld [vmem:[#allocation2 + $0x368] sm:$0xff]  ;;  %v2267_v54 = vpack.c.bf16 %v435_v33, %v433_v31  ;;  %v139_v31 = vld [vmem:[#allocation5 + $0x2d0] sm:$0xff] }
  0x87   :  { %662 = vmatprep.mubr.f32.mxu0 %v250_v60  ;;  %2248 = vmatpush1.bf16.msra.mxu0 %v2247_v32  ;;  %v254_v60 = vmul.f32 %v2744_v2, %v102_v36  ;;  %v261_v32 = vmul.f32 %v2721_v12, %v109_v40  ;;  %v2261_v10 = vpack.c.bf16 %v432_v58, %v430_v57  ;;  %v440_v36 = vld [vmem:[#allocation2 + $0x3b8] sm:$0xff]  ;;  %v113_v40 = vld [vmem:[#allocation5 + $0x200] sm:$0xff] }
  0x88   :  { %2250 = vmatprep.subr.bf16.mxu0 %v2249_v63  ;;  %v268_v63 = vmul.f32 %v2687_v50, %v116_v44  ;;  %1027 = vmatmul.mubr.f32.gmra.mrb[6].mxu1 %v247_v56  ;;  %v120_v44 = vld [vmem:[#allocation5 + $0x238] sm:$0xff]  ;;  %v134_v56 = vld [vmem:[#allocation5 + $0x2a8] sm:$0xff]  ;;  %v437_v58 = vld [vmem:[#allocation2 + $0x3a0] sm:$0xff]  ;;  %v265_v61 = vmul.f32 %v2698_v3, %v113_v40 }
  0x89   :  { %2141 = vmatprep.mubr.msk.f32.mxu1 %vm489_vm0, %v254_v60  ;;  %v439_v60 = vld [vmem:[#allocation2 + $0x3b0] sm:$0xff] }
  0x8a   :  { %663 = vmatmul.mubr.f32.gmra.mrb[16].mxu0 %v249_v47  ;;  %v434_v47 = vld [vmem:[#allocation2 + $0x388] sm:$0xff]  ;;  %v2271_v14 = vpack.c.bf16 %v439_v60, %v437_v58  ;;  %v152_v58 = vld [vmem:[#allocation5 + $0x338] sm:$0xff] }
  0x8b   :  { %668 = vmatprep.mubr.f32.mxu0 %v256_v18  ;;  %2252 = vmatpush1.bf16.msra.mxu0 %v2251_v20  ;;  %v260_v18 = vmul.f32 %v2744_v2, %v108_v62  ;;  %v267_v20 = vmul.f32 %v2721_v12, %v115_v4  ;;  %v2265_v30 = vpack.c.bf16 %v436_v16, %v434_v47  ;;  %v444_v62 = vld [vmem:[#allocation2 + $0x3d8] sm:$0xff]  ;;  %v119_v4 = vld [vmem:[#allocation5 + $0x230] sm:$0xff]  ;;  %v441_v16 = vld [vmem:[#allocation2 + $0x3c0] sm:$0xff] }
  0x8c   :  { %2254 = vmatprep.subr.bf16.mxu0 %v2253_v24  ;;  %v274_v24 = vmul.f32 %v2687_v50, %v122_v8  ;;  %1033 = vmatmul.mubr.f32.gmra.mrb[8].mxu1 %v253_v15  ;;  %v126_v8 = vld [vmem:[#allocation5 + $0x268] sm:$0xff]  ;;  %v140_v15 = vld [vmem:[#allocation5 + $0x2d8] sm:$0xff]  ;;  %v271_v19 = vmul.f32 %v2698_v3, %v119_v4  ;;  %v304_v4 = vmul.f32 %v2687_v50, %v152_v58 }
  0x8d   :  { %2142 = vmatprep.mubr.msk.f32.mxu1 %vm489_vm0, %v260_v18  ;;  %v443_v18 = vld [vmem:[#allocation2 + $0x3d0] sm:$0xff] }
  0x8e   :  { %669 = vmatmul.mubr.f32.gmra.mrb[18].mxu0 %v255_v35  ;;  %v438_v35 = vld [vmem:[#allocation2 + $0x3a8] sm:$0xff]  ;;  %v2275_v33 = vpack.c.bf16 %v443_v18, %v441_v16  ;;  %v157_v18 = vld [vmem:[#allocation5 + $0x360] sm:$0xff] }
  0x8f   :  { %674 = vmatprep.mubr.f32.mxu0 %v262_v37  ;;  %2256 = vmatpush1.bf16.msra.mxu0 %v2255_v42  ;;  %v266_v37 = vmul.f32 %v2744_v2, %v114_v21  ;;  %v273_v42 = vmul.f32 %v2721_v12, %v121_v27  ;;  %v2269_v57 = vpack.c.bf16 %v440_v36, %v438_v35  ;;  %v448_v21 = vld [vmem:[#allocation2 + $0x3f8] sm:$0xff]  ;;  %v125_v27 = vld [vmem:[#allocation5 + $0x260] sm:$0xff] }
  0x90   :  { %2258 = vmatprep.subr.bf16.mxu0 %v2257_v48  ;;  %v280_v48 = vmul.f32 %v2687_v50, %v128_v29  ;;  %1039 = vmatmul.mubr.f32.gmra.mrb[10].mxu1 %v259_v34  ;;  %v132_v29 = vld [vmem:[#allocation5 + $0x298] sm:$0xff]  ;;  %v146_v34 = vld [vmem:[#allocation5 + $0x308] sm:$0xff]  ;;  %v445_v36 = vld [vmem:[#allocation2 + $0x3e0] sm:$0xff]  ;;  %v277_v40 = vmul.f32 %v2698_v3, %v125_v27 }
  0x91   :  { %2143 = vmatprep.mubr.msk.f32.mxu1 %vm489_vm0, %v266_v37  ;;  %v447_v37 = vld [vmem:[#allocation2 + $0x3f0] sm:$0xff]  ;;  %v156_v27 = vld [vmem:[#allocation5 + $0x358] sm:$0xff] }
  0x92   :  { %675 = vmatmul.mubr.f32.gmra.mrb[20].mxu0 %v261_v32  ;;  %v442_v32 = vld [vmem:[#allocation2 + $0x3c8] sm:$0xff] }
  0x93   :  { %680 = vmatprep.mubr.f32.mxu0 %v268_v63  ;;  %2260 = vmatpush1.bf16.msra.mxu0 %v2259_v6  ;;  %v272_v63 = vmul.f32 %v2744_v2, %v120_v44  ;;  %v279_v6 = vmul.f32 %v2721_v12, %v127_v53  ;;  %v2273_v47 = vpack.c.bf16 %v444_v62, %v442_v32  ;;  %v131_v44 = vld [vmem:[#allocation5 + $0x290] sm:$0xff]  ;;  %v138_v53 = vld [vmem:[#allocation5 + $0x2c8] sm:$0xff]  ;;  %v137_v32 = vld [vmem:[#allocation5 + $0x2c0] sm:$0xff] }
  0x94   :  { %2262 = vmatprep.subr.bf16.mxu0 %v2261_v10  ;;  %v286_v10 = vmul.f32 %v2687_v50, %v134_v56  ;;  %1045 = vmatmul.mubr.f32.gmra.mrb[12].mxu1 %v265_v61  ;;  %v145_v56 = vld [vmem:[#allocation5 + $0x300] sm:$0xff]  ;;  %v283_v60 = vmul.f32 %v2698_v3, %v131_v44  ;;  %v290_v61 = vmul.f32 %v2744_v2, %v138_v53 }
  0x95   :  { %2144 = vmatprep.mubr.msk.f32.mxu1 %vm489_vm0, %v272_v63  ;;  %v297_v62 = vmul.f32 %v2721_v12, %v145_v56  ;;  %v144_v63 = vld [vmem:[#allocation5 + $0x2f8] sm:$0xff]  ;;  %v57_v56 = vld [vmem:[#allocation5 + $0x40] sm:$0xff] }
  0x96   :  { %681 = vmatmul.mubr.f32.gmra.mrb[22].mxu0 %v267_v20  ;;  %v446_v20 = vld [vmem:[#allocation2 + $0x3e8] sm:$0xff] }
  0x97   :  { %686 = vmatprep.mubr.f32.mxu0 %v274_v24  ;;  %2264 = vmatpush1.bf16.msra.mxu0 %v2263_v28  ;;  %v278_v24 = vmul.f32 %v2744_v2, %v126_v8  ;;  %v285_v28 = vmul.f32 %v2721_v12, %v133_v13  ;;  %v2277_v35 = vpack.c.bf16 %v448_v21, %v446_v20  ;;  %v158_v8 = vld [vmem:[#allocation5 + $0x368] sm:$0xff]  ;;  %v149_v21 = vld [vmem:[#allocation5 + $0x320] sm:$0xff] }
  0x98   :  { %2266 = vmatprep.subr.bf16.mxu0 %v2265_v30  ;;  %v292_v30 = vmul.f32 %v2687_v50, %v140_v15  ;;  %1051 = vmatmul.mubr.f32.gmra.mrb[14].mxu1 %v271_v19  ;;  %v296_v13 = vmul.f32 %v2744_v2, %v144_v63  ;;  %v310_v16 = vmul.f32 %v2687_v50, %v158_v8  ;;  %v164_v19 = vld [vmem:[#allocation5 + $0x398] sm:$0xff]  ;;  %v63_v63 = vld [vmem:[#allocation5 + $0x70] sm:$0xff] }
  0x99   :  { %2145 = vmatprep.mubr.msk.f32.mxu1 %vm489_vm0, %v278_v24  ;;  %v309_v24 = vmul.f32 %v2721_v12, %v157_v18  ;;  %v215_v8 = vmul.f32 %v2693_v52, %v63_v63  ;;  %v88_v18 = vld [vmem:[#allocation5 + $0x138] sm:$0xff] }
  0x9a   :  { %687 = vmatmul.mubr.f32.gmra.mrb[24].mxu0 %v273_v42  ;;  %v284_v42 = vmul.f32 %v2744_v2, %v132_v29  ;;  %v163_v29 = vld [vmem:[#allocation5 + $0x390] sm:$0xff] }
  0x9b   :  { %692 = vmatprep.mubr.f32.mxu0 %v280_v48  ;;  %2268 = vmatpush1.bf16.msra.mxu0 %v2267_v54  ;;  %v291_v48 = vmul.f32 %v2721_v12, %v139_v31  ;;  %v298_v54 = vmul.f32 %v2687_v50, %v146_v34  ;;  %v301_v31 = vmul.f32 %v2698_v3, %v149_v21  ;;  %v155_v34 = vld [vmem:[#allocation5 + $0x350] sm:$0xff]  ;;  %v93_v21 = vld [vmem:[#allocation5 + $0x160] sm:$0xff] }
  0x9c   :  { %2270 = vmatprep.subr.bf16.mxu0 %v2269_v57  ;;  %v2279_v57 = vpack.c.bf16 %v447_v37, %v445_v36  ;;  %1057 = vmatmul.mubr.f32.gmra.mrb[16].mxu1 %v277_v40  ;;  %v162_v36 = vld [vmem:[#allocation5 + $0x388] sm:$0xff]  ;;  %v51_v40 = vld [vmem:[#allocation5 + $0x10] sm:$0xff] }
  0x9d   :  { %2146 = vmatprep.mubr.msk.f32.mxu1 %vm489_vm0, %v284_v42  ;;  %v58_v42 = vld [vmem:[#allocation5 + $0x48] sm:$0xff]  ;;  %v314_v44 = vmul.f32 %v2744_v2, %v162_v36  ;;  %v203_v53 = vmul.f32 %v2693_v52, %v51_v40 }
  0x9e   :  { %693 = vmatmul.mubr.f32.gmra.mrb[26].mxu0 %v279_v6  ;;  %v151_v6 = vld [vmem:[#allocation5 + $0x330] sm:$0xff] }
  0x9f   :  { %698 = vmatprep.mubr.f32.mxu0 %v286_v10  ;;  %2272 = vmatpush1.bf16.msra.mxu0 %v2271_v14  ;;  %v289_v10 = vmul.f32 %v2698_v3, %v137_v32  ;;  %v143_v14 = vld [vmem:[#allocation5 + $0x2f0] sm:$0xff]  ;;  %v303_v15 = vmul.f32 %v2721_v12, %v151_v6  ;;  %v209_v32 = vmul.f32 %v2693_v52, %v57_v56  ;;  %v141_v56 = vld [vmem:[#allocation5 + $0x2e0] sm:$0xff] }
  0xa0   :  { %2274 = vmatprep.subr.bf16.mxu0 %v2273_v47  ;;  %1063 = vmatmul.mubr.f32.gmra.mrb[18].mxu1 %v283_v60  ;;  %v150_v47 = vld [vmem:[#allocation5 + $0x328] sm:$0xff] }
  0xa1   :  { %2147 = vmatprep.mubr.msk.f32.mxu1 %vm489_vm0, %v290_v61  ;;  %v302_v20 = vmul.f32 %v2744_v2, %v150_v47  ;;  %v167_v61 = vld [vmem:[#allocation5 + $0x3b0] sm:$0xff]  ;;  %v82_v47 = vld [vmem:[#allocation5 + $0x108] sm:$0xff] }
  0xa2   :  { %699 = vmatmul.mubr.f32.gmra.mrb[28].mxu0 %v285_v28  ;;  %v316_v28 = vmul.f32 %v2687_v50, %v164_v19  ;;  %v307_v50 = vmul.f32 %v2698_v3, %v155_v34  ;;  %v319_v6 = vmul.f32 %v2698_v3, %v167_v61  ;;  %v117_v34 = vld [vmem:[#allocation5 + $0x220] sm:$0xff]  ;;  %v147_v61 = vld [vmem:[#allocation5 + $0x310] sm:$0xff] }
  0xa3   :  { %704 = vmatprep.mubr.f32.mxu0 %v292_v30  ;;  %2276 = vmatpush1.bf16.msra.mxu0 %v2275_v33  ;;  %v52_v30 = vld [vmem:[#allocation5 + $0x18] sm:$0xff]  ;;  %v308_v33 = vmul.f32 %v2744_v2, %v156_v27  ;;  %v99_v27 = vld [vmem:[#allocation5 + $0x190] sm:$0xff] }
  0xa4   :  { %2278 = vmatprep.subr.bf16.mxu0 %v2277_v35  ;;  %1069 = vmatmul.mubr.f32.gmra.mrb[20].mxu1 %v289_v10  ;;  %v315_v35 = vmul.f32 %v2721_v12, %v163_v29  ;;  %v204_v37 = vmul.f32 %v2690_v51, %v52_v30  ;;  %v210_v12 = vmul.f32 %v2690_v51, %v58_v42  ;;  %v69_v10 = vld [vmem:[#allocation5 + $0xa0] sm:$0xff] }
  0xa5   :  { %2148 = vmatprep.mubr.msk.f32.mxu1 %vm489_vm0, %v296_v13  ;;  %v76_v13 = vld [vmem:[#allocation5 + $0xd8] sm:$0xff]  ;;  %v105_v29 = vld [vmem:[#allocation5 + $0x1c0] sm:$0xff] }
  0xa6   :  { %705 = vmatmul.mubr.f32.gmra.mrb[30].mxu0 %v291_v48  ;;  %v161_v48 = vld [vmem:[#allocation5 + $0x380] sm:$0xff]  ;;  %v257_v30 = vmul.f32 %v2693_v52, %v105_v29 }
  0xa7   :  { %710 = vmatprep.mubr.f32.mxu0 %v298_v54  ;;  %2280 = vmatpush1.bf16.msra.mxu0 %v2279_v57  ;;  %v168_v54 = vld [vmem:[#allocation5 + $0x3b8] sm:$0xff]  ;;  %v313_v58 = vmul.f32 %v2698_v3, %v161_v48  ;;  %v129_v42 = vld [vmem:[#allocation5 + $0x280] sm:$0xff]  ;;  %v135_v48 = vld [vmem:[#allocation5 + $0x2b0] sm:$0xff] }
  0xa8   :  { %2282 = vmatprep.subr.bf16.mxu0 %v2700_v38  ;;  %v295_v38 = vmul.f32 %v2698_v3, %v143_v14  ;;  %v64_v57 = vld [vmem:[#allocation5 + $0x78] sm:$0xff]  ;;  %v320_v60 = vmul.f32 %v2744_v2, %v168_v54  ;;  %v228_v14 = vmul.f32 %v2690_v51, %v76_v13  ;;  %v287_v54 = vmul.f32 %v2693_v52, %v135_v48  ;;  %v166_v13 = vld [vmem:[#allocation5 + $0x3a8] sm:$0xff] }
  0xaa   :  { %711 = vmatmul.mubr.f32.gmra.mrb[32].mxu0 %v297_v62  ;;  %1075 = vmatmul.mubr.f32.gmra.mrb[22].mxu1 %v295_v38  ;;  %v216_v62 = vmul.f32 %v2690_v51, %v64_v57  ;;  %v87_v38 = vld [vmem:[#allocation5 + $0x130] sm:$0xff]  ;;  %v148_v57 = vld [vmem:[#allocation5 + $0x318] sm:$0xff] }
  0xab   :  { %716 = vmatprep.mubr.f32.mxu0 %v304_v4  ;;  %2149 = vmatprep.mubr.msk.f32.mxu1 %vm489_vm0, %v302_v20  ;;  %v70_v4 = vld [vmem:[#allocation5 + $0xa8] sm:$0xff]  ;;  %v239_v20 = vmul.f32 %v2693_v52, %v87_v38  ;;  %v59_v38 = vld [vmem:[#allocation5 + $0x50] sm:$0xff] }
  0xae   :  { %717 = vmatmul.mubr.f32.gmra.mrb[34].mxu0 %v303_v15  ;;  %1081 = vmatmul.mubr.f32.gmra.mrb[24].mxu1 %v301_v31  ;;  %v75_v15 = vld [vmem:[#allocation5 + $0xd0] sm:$0xff] }
  0xaf   :  { %722 = vmatprep.mubr.f32.mxu0 %v310_v16  ;;  %2150 = vmatprep.mubr.msk.f32.mxu1 %vm489_vm0, %v308_v33  ;;  %v234_v16 = vmul.f32 %v2690_v51, %v82_v47  ;;  %v111_v31 = vld [vmem:[#allocation5 + $0x1f0] sm:$0xff]  ;;  %v54_v47 = vld [vmem:[#allocation5 + $0x28] sm:$0xff] }
  0xb0   :  { %v263_v33 = vmul.f32 %v2693_v52, %v111_v31 }
  0xb2   :  { %723 = vmatmul.mubr.f32.gmra.mrb[36].mxu0 %v309_v24  ;;  %1087 = vmatmul.mubr.f32.gmra.mrb[26].mxu1 %v307_v50  ;;  %v245_v24 = vmul.f32 %v2693_v52, %v93_v21  ;;  %v136_v50 = vld [vmem:[#allocation5 + $0x2b8] sm:$0xff] }
  0xb3   :  { %728 = vmatprep.mubr.f32.mxu0 %v316_v28  ;;  %2151 = vmatprep.mubr.msk.f32.mxu1 %vm489_vm0, %v314_v44  ;;  %v251_v28 = vmul.f32 %v2693_v52, %v99_v27  ;;  %v288_v44 = vmul.f32 %v2690_v51, %v136_v50  ;;  %v2615_v27 = vmov 0.0|0.0  }
  0xb4   :  { %2321 = vmatprep.subr.bf16.mxu1 %v2615_v27 }
  0xb6   :  { %729 = vmatmul.mubr.f32.gmra.mrb[38].mxu0 %v315_v35  ;;  %1093 = vmatmul.mubr.f32.gmra.mrb[28].mxu1 %v313_v58  ;;  %v269_v35 = vmul.f32 %v2693_v52, %v117_v34  ;;  %v293_v58 = vmul.f32 %v2693_v52, %v141_v56 }
  0xb7   :  { %799 = vmatprep.mubr.f32.mxu0 %v204_v37  ;;  %2152 = vmatprep.mubr.msk.f32.mxu1 %vm489_vm0, %v320_v60  ;;  %v130_v37 = vld [vmem:[#allocation5 + $0x288] sm:$0xff]  ;;  %v300_v60 = vmul.f32 %v2690_v51, %v148_v57 }
  0xb8   :  { %v282_v40 = vmul.f32 %v2690_v51, %v130_v37 }
  0xba   :  { %800 = vmatmul.mubr.f32.vlgmr.msra.gmra.mrb[0].mxu0 %v203_v53  ;;  %1099 = vmatmul.mubr.f32.gmra.mrb[30].mxu1 %v319_v6  ;;  %v142_v53 = vld [vmem:[#allocation5 + $0x2e8] sm:$0xff]  ;;  %v160_v6 = vld [vmem:[#allocation5 + $0x378] sm:$0xff] }
  0xbb   :  { %2284 = vmatpush1.bf16.msra.mxu0 %v2702_v39  ;;  %805 = vmatprep.mubr.f32.mxu0 %v210_v12  ;;  %v222_v39 = vmul.f32 %v2690_v51, %v70_v4  ;;  %v294_v12 = vmul.f32 %v2690_v51, %v142_v53  ;;  %v153_v4 = vld [vmem:[#allocation5 + $0x340] sm:$0xff] }
  0xbc   :  { %2286 = vmatprep.subr.bf16.mxu0 %v2705_v43  ;;  %v221_v43 = vmul.f32 %v2693_v52, %v69_v10  ;;  %v159_v10 = vld [vmem:[#allocation5 + $0x370] sm:$0xff] }
  0xbe   :  { %806 = vmatmul.mubr.f32.gmra.mrb[2].mxu0 %v209_v32  ;;  %v154_v32 = vld [vmem:[#allocation5 + $0x348] sm:$0xff] }
  0xbf   :  { %811 = vmatprep.mubr.f32.mxu0 %v216_v62  ;;  %2288 = vmatpush1.bf16.msra.mxu0 %v2709_v55  ;;  %v227_v55 = vmul.f32 %v2693_v52, %v75_v15  ;;  %v299_v62 = vmul.f32 %v2693_v52, %v147_v61  ;;  %v306_v63 = vmul.f32 %v2690_v51, %v154_v32  ;;  %v165_v15 = vld [vmem:[#allocation5 + $0x3a0] sm:$0xff] }
  0xc0   :  { %2290 = vmatprep.subr.bf16.mxu0 %v2711_v59  ;;  %v81_v59 = vld [vmem:[#allocation5 + $0x100] sm:$0xff] }
  0xc1   :  { %v233_v19 = vmul.f32 %v2693_v52, %v81_v59  ;;  %v53_v59 = vld [vmem:[#allocation5 + $0x20] sm:$0xff] }
  0xc2   :  { %812 = vmatmul.mubr.f32.gmra.mrb[4].mxu0 %v215_v8  ;;  %v305_v8 = vmul.f32 %v2693_v52, %v153_v4 }
  0xc3   :  { %817 = vmatprep.mubr.f32.mxu0 %v222_v39  ;;  %2292 = vmatpush1.bf16.msra.mxu0 %v2715_v1  ;;  %v240_v1 = vmul.f32 %v2690_v51, %v88_v18  ;;  %v312_v39 = vmul.f32 %v2690_v51, %v160_v6  ;;  %v60_v18 = vld [vmem:[#allocation5 + $0x58] sm:$0xff] }
  0xc4   :  { %2294 = vmatprep.subr.bf16.mxu0 %v2718_v7  ;;  %v94_v7 = vld [vmem:[#allocation5 + $0x168] sm:$0xff] }
  0xc6   :  { %818 = vmatmul.mubr.f32.gmra.mrb[6].mxu0 %v221_v43  ;;  %v311_v43 = vmul.f32 %v2693_v52, %v159_v10 }
  0xc7   :  { %823 = vmatprep.mubr.f32.mxu0 %v228_v14  ;;  %2296 = vmatpush1.bf16.msra.mxu0 %v2724_v17  ;;  %v246_v17 = vmul.f32 %v2690_v51, %v94_v7  ;;  %v318_v14 = vmul.f32 %v2690_v51, %v166_v13  ;;  %v66_v7 = vld [vmem:[#allocation5 + $0x88] sm:$0xff] }
  0xc8   :  { %2298 = vmatprep.subr.bf16.mxu0 %v2727_v23  ;;  %v100_v23 = vld [vmem:[#allocation5 + $0x198] sm:$0xff] }
  0xca   :  { %824 = vmatmul.mubr.f32.gmra.mrb[8].mxu0 %v227_v55  ;;  %v317_v55 = vmul.f32 %v2693_v52, %v165_v15 }
  0xcb   :  { %829 = vmatprep.mubr.f32.mxu0 %v234_v16  ;;  %2300 = vmatpush1.bf16.msra.mxu0 %v2733_v41  ;;  %v252_v41 = vmul.f32 %v2690_v51, %v100_v23  ;;  %v206_v16 = vmul.f32 %v2744_v2, %v54_v47 }
  0xcc   :  { %2302 = vmatprep.subr.bf16.mxu0 %v2736_v45  ;;  %v106_v45 = vld [vmem:[#allocation5 + $0x1c8] sm:$0xff] }
  0xce   :  { %830 = vmatmul.mubr.f32.gmra.mrb[10].mxu0 %v233_v19  ;;  %v205_v19 = vmul.f32 %v2698_v3, %v53_v59 }
  0xcf   :  { %835 = vmatprep.mubr.f32.mxu0 %v240_v1  ;;  %2304 = vmatpush1.bf16.msra.mxu0 %v2741_v0  ;;  %v258_v0 = vmul.f32 %v2690_v51, %v106_v45  ;;  %v212_v1 = vmul.f32 %v2744_v2, %v60_v18  ;;  %v2616_v45 = vmov 1.0|1.0  }
  0xd0   :  { %2306 = vmatprep.subr.bf16.mxu0 %v2747_v5  ;;  %v112_v5 = vld [vmem:[#allocation5 + $0x1f8] sm:$0xff]  ;;  %2322 = vmatpush1.bf16.msra.mxu1 %v2616_v45 }
  0xd1   :  { %2323 = vmatprep.subr.bf16.mxu1 %v2615_v27 }
  0xd2   :  { %836 = vmatmul.mubr.f32.gmra.mrb[12].mxu0 %v239_v20  ;;  %v65_v20 = vld [vmem:[#allocation5 + $0x80] sm:$0xff] }
  0xd3   :  { %841 = vmatprep.mubr.f32.mxu0 %v246_v17  ;;  %2308 = vmatpush1.bf16.msra.mxu0 %v2752_v22  ;;  %v264_v22 = vmul.f32 %v2690_v51, %v112_v5  ;;  %v72_v17 = vld [vmem:[#allocation5 + $0xb8] sm:$0xff]  ;;  %v217_v21 = vmul.f32 %v2698_v3, %v65_v20 }
  0xd4   :  { %2310 = vmatprep.subr.bf16.mxu0 %v2756_v26  ;;  %v118_v26 = vld [vmem:[#allocation5 + $0x228] sm:$0xff]  ;;  %v224_v23 = vmul.f32 %v2744_v2, %v72_v17  ;;  %2324 = vmatpush1.bf16.msra.mxu1 %v2616_v45 }
  0xd5   :  { %2325 = vmatprep.subr.bf16.mxu1 %v2615_v27 }
  0xd6   :  { %842 = vmatmul.mubr.f32.gmra.mrb[14].mxu0 %v245_v24  ;;  %v71_v24 = vld [vmem:[#allocation5 + $0xb0] sm:$0xff] }
  0xd7   :  { %847 = vmatprep.mubr.f32.mxu0 %v252_v41  ;;  %2312 = vmatpush1.bf16.msra.mxu0 %v2762_v46  ;;  %v270_v46 = vmul.f32 %v2690_v51, %v118_v26  ;;  %v223_v41 = vmul.f32 %v2698_v3, %v71_v24 }
  0xd8   :  { %2314 = vmatprep.subr.bf16.mxu0 %v2765_v49  ;;  %v124_v49 = vld [vmem:[#allocation5 + $0x258] sm:$0xff]  ;;  %2326 = vmatpush1.bf16.msra.mxu1 %v2616_v45 }
  0xd9   :  { %v276_v36 = vmul.f32 %v2690_v51, %v124_v49  ;;  %v211_v51 = vmul.f32 %v2698_v3, %v59_v38  ;;  %2327 = vmatprep.subr.bf16.mxu1 %v2615_v27 }
  0xda   :  { %848 = vmatmul.mubr.f32.gmra.mrb[16].mxu0 %v251_v28 }
  0xdb   :  { %853 = vmatprep.mubr.f32.mxu0 %v258_v0  ;;  %2316 = vmatpush1.bf16.msra.mxu0 %v2770_v9  ;;  %v123_v9 = vld [vmem:[#allocation5 + $0x250] sm:$0xff] }
  0xdc   :  { %2318 = vmatprep.subr.bf16.mxu0 %v2773_v11  ;;  %v275_v11 = vmul.f32 %v2693_v52, %v123_v9  ;;  %2328 = vmatpush1.bf16.msra.mxu1 %v2616_v45 }
  0xdd   :  { %2329 = vmatprep.subr.bf16.mxu1 %v2615_v27 }
  0xde   :  { %854 = vmatmul.mubr.f32.gmra.mrb[18].mxu0 %v257_v30 }
  0xdf   :  { %859 = vmatprep.mubr.f32.mxu0 %v264_v22  ;;  %2320 = vmatpush1.bf16.msra.mxu0 %v2778_v25  ;;  %v281_v25 = vmul.f32 %v2693_v52, %v129_v42  ;;  %v218_v52 = vmul.f32 %v2744_v2, %v66_v7 }
  0xe0   :  { %2330 = vmatpush1.bf16.msra.mxu1 %v2616_v45 }
  0xe1   :  { %2331 = vmatprep.subr.bf16.mxu1 %v2615_v27 }
  0xe2   :  { %860 = vmatmul.mubr.f32.gmra.mrb[20].mxu0 %v263_v33 }
  0xe3   :  { %865 = vmatprep.mubr.f32.mxu0 %v270_v46 }
  0xe4   :  { %2332 = vmatpush1.bf16.msra.mxu1 %v2616_v45 }
  0xe5   :  { %2333 = vmatprep.subr.bf16.mxu1 %v2615_v27 }
  0xe6   :  { %866 = vmatmul.mubr.f32.gmra.mrb[22].mxu0 %v269_v35 }
  0xe7   :  { %871 = vmatprep.mubr.f32.mxu0 %v276_v36 }
  0xe8   :  { %2334 = vmatpush1.bf16.msra.mxu1 %v2616_v45 }
  0xe9   :  { %2335 = vmatprep.subr.bf16.mxu1 %v2615_v27 }
  0xea   :  { %872 = vmatmul.mubr.f32.gmra.mrb[24].mxu0 %v275_v11 }
  0xeb   :  { %877 = vmatprep.mubr.f32.mxu0 %v282_v40 }
  0xec   :  { %2336 = vmatpush1.bf16.msra.mxu1 %v2616_v45 }
  0xed   :  { %2337 = vmatprep.subr.bf16.mxu1 %v2615_v27 }
  0xee   :  { %878 = vmatmul.mubr.f32.gmra.mrb[26].mxu0 %v281_v25 }
  0xef   :  { %883 = vmatprep.mubr.f32.mxu0 %v288_v44 }
  0xf0   :  { %2338 = vmatpush1.bf16.msra.mxu1 %v2616_v45 }
  0xf1   :  { %2339 = vmatprep.subr.bf16.mxu1 %v2615_v27 }
  0xf2   :  { %884 = vmatmul.mubr.f32.gmra.mrb[28].mxu0 %v287_v54 }
  0xf3   :  { %889 = vmatprep.mubr.f32.mxu0 %v294_v12 }
  0xf4   :  { %2340 = vmatpush1.bf16.msra.mxu1 %v2616_v45 }
  0xf5   :  { %2341 = vmatprep.subr.bf16.mxu1 %v2615_v27 }
  0xf6   :  { %890 = vmatmul.mubr.f32.gmra.mrb[30].mxu0 %v293_v58 }
  0xf7   :  { %895 = vmatprep.mubr.f32.mxu0 %v300_v60 }
  0xf8   :  { %2342 = vmatpush1.bf16.msra.mxu1 %v2616_v45 }
  0xf9   :  { %2343 = vmatprep.subr.bf16.mxu1 %v2615_v27 }
  0xfa   :  { %896 = vmatmul.mubr.f32.gmra.mrb[32].mxu0 %v299_v62 }
  0xfb   :  { %901 = vmatprep.mubr.f32.mxu0 %v306_v63 }
  0xfc   :  { %2344 = vmatpush1.bf16.msra.mxu1 %v2616_v45 }
  0xfd   :  { %2345 = vmatprep.subr.bf16.mxu1 %v2615_v27 }
  0xfe   :  { %902 = vmatmul.mubr.f32.gmra.mrb[34].mxu0 %v305_v8 }
  0xff   :  { %907 = vmatprep.mubr.f32.mxu0 %v312_v39 }
 0x100   :  { %2346 = vmatpush1.bf16.msra.mxu1 %v2616_v45 }
 0x101   :  { %2347 = vmatprep.subr.bf16.mxu1 %v2615_v27 }
 0x102   :  { %908 = vmatmul.mubr.f32.gmra.mrb[36].mxu0 %v311_v43 }
 0x103   :  { %913 = vmatprep.mubr.f32.mxu0 %v318_v14 }
 0x104   :  { %2348 = vmatpush1.bf16.msra.mxu1 %v2616_v45 }
 0x105   :  { %2349 = vmatprep.subr.bf16.mxu1 %v2615_v27 }
 0x106   :  { %914 = vmatmul.mubr.f32.gmra.mrb[38].mxu0 %v317_v55 }
 0x107   :  { %2133 = vmatprep.mubr.msk.f32.mxu0 %vm489_vm0, %v206_v16 }
 0x108   :  { %2350 = vmatpush1.bf16.msra.mxu1 %v2616_v45 }
 0x109   :  { %2351 = vmatprep.subr.bf16.mxu1 %v2615_v27 }
 0x10a   :  { %985 = vmatmul.mubr.f32.vlgmr.msra.gmra.mrb[0].mxu0 %v205_v19 }
 0x10b   :  { %2134 = vmatprep.mubr.msk.f32.mxu0 %vm489_vm0, %v212_v1 }
 0x10c   :  { %2352 = vmatpush1.bf16.msra.mxu1 %v2616_v45 }
 0x10d   :  { %2353 = vmatprep.subr.bf16.mxu1 %v2615_v27 }
 0x10e   :  { %991 = vmatmul.mubr.f32.gmra.mrb[2].mxu0 %v211_v51 }
 0x10f   :  { %2135 = vmatprep.mubr.msk.f32.mxu0 %vm489_vm0, %v218_v52 }
 0x112   :  { %997 = vmatmul.mubr.f32.gmra.mrb[4].mxu0 %v217_v21 }
 0x113   :  { %2136 = vmatprep.mubr.msk.f32.mxu0 %vm489_vm0, %v224_v23 }
 0x116   :  { %1003 = vmatmul.mubr.f32.gmra.mrb[6].mxu0 %v223_v41 }
 0x14f   :  { %v1010_v3 = vpop.f32.mrb[0].mxu1 }
 0x150   :  { %v1012_v2 = vpop.f32.mrb[1].mxu1 }
 0x153   :  { %v1016_v28 = vpop.f32.mrb[2].mxu1 }
 0x154   :  { %v1018_v0 = vpop.f32.mrb[3].mxu1 }
 0x157   :  { %v1022_v29 = vpop.f32.mrb[4].mxu1 }
 0x158   :  { %v1024_v5 = vpop.f32.mrb[5].mxu1 }
 0x15b   :  { %v1028_v30 = vpop.f32.mrb[6].mxu1 }
 0x15c   :  { %v1030_v22 = vpop.f32.mrb[7].mxu1 }
 0x15f   :  { %v1034_v31 = vpop.f32.mrb[8].mxu1 }
 0x160   :  { %v1036_v26 = vpop.f32.mrb[9].mxu1 }
 0x163   :  { %v1040_v33 = vpop.f32.mrb[10].mxu1 }
 0x164   :  { %v1042_v46 = vpop.f32.mrb[11].mxu1 }
 0x167   :  { %v1046_v34 = vpop.f32.mrb[12].mxu1 }
 0x168   :  { %v1048_v49 = vpop.f32.mrb[13].mxu1 }
 0x16b   :  { %v1052_v35 = vpop.f32.mrb[14].mxu1 }
 0x16c   :  { %v1054_v36 = vpop.f32.mrb[15].mxu1 }
 0x16f   :  { %v1058_v9 = vpop.f32.mrb[16].mxu1 }
 0x170   :  { %v1060_v37 = vpop.f32.mrb[17].mxu1 }
 0x173   :  { %v1064_v11 = vpop.f32.mrb[18].mxu1 }
 0x174   :  { %v1066_v40 = vpop.f32.mrb[19].mxu1 }
 0x177   :  { %v1070_v42 = vpop.f32.mrb[20].mxu1 }
 0x178   :  { %v1072_v50 = vpop.f32.mrb[21].mxu1 }
 0x17d   :  { %v1076_v25 = vpop.f32.mrb[22].mxu1 }
 0x17e   :  { %v1078_v44 = vpop.f32.mrb[23].mxu1 }
 0x181   :  { %v1082_v48 = vpop.f32.mrb[24].mxu1 }
 0x182   :  { %v1084_v53 = vpop.f32.mrb[25].mxu1 }
 0x185   :  { %v1088_v54 = vpop.f32.mrb[26].mxu1 }
 0x186   :  { %v1090_v12 = vpop.f32.mrb[27].mxu1 }
 0x189   :  { %v1094_v56 = vpop.f32.mrb[28].mxu1 }
 0x18a   :  { %v1096_v57 = vpop.f32.mrb[29].mxu1 }
 0x18d   :  { %v2960_v58 = vpop.f32.mrb[30].mxu1 }
 0x18e   :  { %v2962_v60 = vpop.f32.mrb[31].mxu1 }
 0x19d   :  { %v825_v61 = vpop.f32.mrb[8].mxu0 }
 0x19e   :  { %v2964_v32 = vadd.f32 %v1010_v3, %v825_v61  ;;  %v827_v62 = vpop.f32.mrb[9].mxu0 }
 0x19f   :  { %v2966_v63 = vadd.f32 %v1012_v2, %v827_v62 }
 0x1a1   :  { %v831_v4 = vpop.f32.mrb[10].mxu0 }
 0x1a2   :  { %v2968_v6 = vadd.f32 %v1016_v28, %v831_v4  ;;  %v833_v8 = vpop.f32.mrb[11].mxu0 }
 0x1a3   :  { %v2970_v39 = vadd.f32 %v1018_v0, %v833_v8 }
 0x1a5   :  { %v837_v10 = vpop.f32.mrb[12].mxu0 }
 0x1a6   :  { %v2972_v13 = vadd.f32 %v1022_v29, %v837_v10  ;;  %v839_v43 = vpop.f32.mrb[13].mxu0 }
 0x1a7   :  { %v2974_v14 = vadd.f32 %v1024_v5, %v839_v43 }
 0x1a9   :  { %v843_v15 = vpop.f32.mrb[14].mxu0 }
 0x1aa   :  { %v2976_v47 = vadd.f32 %v1028_v30, %v843_v15  ;;  %v845_v55 = vpop.f32.mrb[15].mxu0 }
 0x1ab   :  { %v2978_v16 = vadd.f32 %v1030_v22, %v845_v55 }
 0x1ad   :  { %v849_v59 = vpop.f32.mrb[16].mxu0 }
 0x1ae   :  { %v2980_v18 = vadd.f32 %v1034_v31, %v849_v59  ;;  %v851_v19 = vpop.f32.mrb[17].mxu0 }
 0x1af   :  { %v2982_v1 = vadd.f32 %v1036_v26, %v851_v19 }
 0x1b1   :  { %v855_v38 = vpop.f32.mrb[18].mxu0 }
 0x1b2   :  { %v2984_v7 = vadd.f32 %v1040_v33, %v855_v38  ;;  %v857_v51 = vpop.f32.mrb[19].mxu0 }
 0x1b3   :  { %v2986_v52 = vadd.f32 %v1042_v46, %v857_v51 }
 0x1b5   :  { %v861_v20 = vpop.f32.mrb[20].mxu0 }
 0x1b6   :  { %v2988_v17 = vadd.f32 %v1046_v34, %v861_v20  ;;  %v863_v21 = vpop.f32.mrb[21].mxu0 }
 0x1b7   :  { %v2990_v23 = vadd.f32 %v1048_v49, %v863_v21 }
 0x1b9   :  { %v867_v24 = vpop.f32.mrb[22].mxu0 }
 0x1ba   :  { %v2992_v41 = vadd.f32 %v1052_v35, %v867_v24  ;;  %v869_v3 = vpop.f32.mrb[23].mxu0 }
 0x1bb   :  { %v2994_v2 = vadd.f32 %v1054_v36, %v869_v3 }
 0x1bd   :  { %v873_v28 = vpop.f32.mrb[24].mxu0 }
 0x1be   :  { %v2996_v0 = vadd.f32 %v1058_v9, %v873_v28  ;;  %v875_v29 = vpop.f32.mrb[25].mxu0  ;;  %v1359_v28 = vmul.f32 %v2966_v63, %v2966_v63 }
 0x1bf   :  { %v2998_v5 = vadd.f32 %v1060_v37, %v875_v29  ;;  %v1358_v29 = vmul.f32 %v2964_v32, %v2964_v32 }
 0x1c1   :  { %3533 = vst [vmem:[#allocation11_spill] sm:$0xff] %v2998_v5  ;;  %v879_v30 = vpop.f32.mrb[26].mxu0 }
 0x1c2   :  { %v3000_v22 = vadd.f32 %v1064_v11, %v879_v30  ;;  %v881_v31 = vpop.f32.mrb[27].mxu0  ;;  %v1361_v30 = vmul.f32 %v2970_v39, %v2970_v39 }
 0x1c3   :  { %v3002_v26 = vadd.f32 %v1066_v40, %v881_v31  ;;  %v1360_v31 = vmul.f32 %v2968_v6, %v2968_v6 }
 0x1c4   :  { %3534 = vst [vmem:[#allocation12_spill] sm:$0xff] %v3000_v22 }
 0x1c5   :  { %3535 = vst [vmem:[#allocation13_spill] sm:$0xff] %v3002_v26  ;;  %v885_v33 = vpop.f32.mrb[28].mxu0 }
 0x1c6   :  { %v3004_v46 = vadd.f32 %v1070_v42, %v885_v33  ;;  %v887_v34 = vpop.f32.mrb[29].mxu0  ;;  %v1363_v33 = vmul.f32 %v2974_v14, %v2974_v14 }
 0x1c7   :  { %v3006_v49 = vadd.f32 %v1072_v50, %v887_v34  ;;  %v1362_v34 = vmul.f32 %v2972_v13, %v2972_v13 }
 0x1c8   :  { %3536 = vst [vmem:[#allocation14_spill] sm:$0xff] %v3004_v46 }
 0x1c9   :  { %3537 = vst [vmem:[#allocation15_spill] sm:$0xff] %v3006_v49  ;;  %v891_v35 = vpop.f32.mrb[30].mxu0 }
 0x1ca   :  { %v3008_v36 = vadd.f32 %v1076_v25, %v891_v35  ;;  %v893_v9 = vpop.f32.mrb[31].mxu0  ;;  %v1365_v35 = vmul.f32 %v2978_v16, %v2978_v16 }
 0x1cb   :  { %v3010_v61 = vadd.f32 %v1078_v44, %v893_v9  ;;  %v1364_v9 = vmul.f32 %v2976_v47, %v2976_v47 }
 0x1cc   :  { %3538 = vst [vmem:[#allocation16_spill] sm:$0xff] %v3008_v36 }
 0x1cd   :  { %3539 = vst [vmem:[#allocation17_spill] sm:$0xff] %v3010_v61  ;;  %v897_v37 = vpop.f32.mrb[32].mxu0 }
 0x1ce   :  { %v3012_v62 = vadd.f32 %v1082_v48, %v897_v37  ;;  %v899_v11 = vpop.f32.mrb[33].mxu0  ;;  %v1367_v37 = vmul.f32 %v2982_v1, %v2982_v1 }
 0x1cf   :  { %v3014_v4 = vadd.f32 %v1084_v53, %v899_v11  ;;  %v1366_v11 = vmul.f32 %v2980_v18, %v2980_v18 }
 0x1d0   :  { %3540 = vst [vmem:[#allocation18_spill] sm:$0xff] %v3012_v62 }
 0x1d1   :  { %3541 = vst [vmem:[#allocation19_spill] sm:$0xff] %v3014_v4  ;;  %v903_v40 = vpop.f32.mrb[34].mxu0 }
 0x1d2   :  { %v3016_v8 = vadd.f32 %v1088_v54, %v903_v40  ;;  %v905_v42 = vpop.f32.mrb[35].mxu0  ;;  %v1369_v40 = vmul.f32 %v2986_v52, %v2986_v52 }
 0x1d3   :  { %v3018_v10 = vadd.f32 %v1090_v12, %v905_v42  ;;  %v1368_v42 = vmul.f32 %v2984_v7, %v2984_v7 }
 0x1d4   :  { %3542 = vst [vmem:[#allocation20_spill] sm:$0xff] %v3016_v8 }
 0x1d5   :  { %3543 = vst [vmem:[#allocation21_spill] sm:$0xff] %v3018_v10  ;;  %v909_v50 = vpop.f32.mrb[36].mxu0 }
 0x1d6   :  { %v3020_v43 = vadd.f32 %v1094_v56, %v909_v50  ;;  %v911_v25 = vpop.f32.mrb[37].mxu0  ;;  %v1371_v50 = vmul.f32 %v2990_v23, %v2990_v23 }
 0x1d7   :  { %v3022_v15 = vadd.f32 %v1096_v57, %v911_v25  ;;  %v1370_v25 = vmul.f32 %v2988_v17, %v2988_v17 }
 0x1d8   :  { %3544 = vst [vmem:[#allocation22_spill] sm:$0xff] %v3020_v43 }
 0x1d9   :  { %3545 = vst [vmem:[#allocation23_spill] sm:$0xff] %v3022_v15  ;;  %v915_v44 = vpop.f32.mrb[38].mxu0 }
 0x1da   :  { %v3025_v55 = vadd.f32 %v2960_v58, %v915_v44  ;;  %v917_v48 = vpop.f32.mrb[39].mxu0  ;;  %v1373_v44 = vmul.f32 %v2994_v2, %v2994_v2 }
 0x1db   :  { %v3028_v53 = vadd.f32 %v2962_v60, %v917_v48  ;;  %v1372_v48 = vmul.f32 %v2992_v41, %v2992_v41 }
 0x1dc   :  { %3546 = vst [vmem:[#allocation24_spill] sm:$0xff] %v3025_v55 }
 0x1dd   :  { %3547 = vst [vmem:[#allocation25_spill] sm:$0xff] %v3028_v53  ;;  %v3030_v59 = vpop.f32.mrb[0].mxu0 }
 0x1de   :  { %v3032_v54 = vpop.f32.mrb[1].mxu0 }
 0x1df   :  { %1249 = vmatprep.mubr.f32.mxu1 %v3032_v54 }
 0x1e0   :  { %1250 = vmatmul.mubr.f32.vlgmr.msra.gmra.mrb[32].mxu1 %v3030_v59 }
 0x1e1   :  { %v3036_v12 = vpop.f32.mrb[2].mxu0  ;;  %2354 = vmatpush1.bf16.msra.mxu1 %v2616_v45 }
 0x1e2   :  { %v3039_v56 = vpop.f32.mrb[3].mxu0  ;;  %2355 = vmatprep.subr.bf16.mxu1 %v2615_v27  ;;  %v1352_v51 = vmul.f32 %v3036_v12, %v3036_v12 }
 0x1e3   :  { %1254 = vmatprep.mubr.f32.mxu1 %v3039_v56  ;;  %v1353_v38 = vmul.f32 %v3039_v56, %v3039_v56 }
 0x1e4   :  { %1255 = vmatmul.mubr.f32.gmra.mrb[34].mxu1 %v3036_v12 }
 0x1e5   :  { %v3044_v57 = vpop.f32.mrb[4].mxu0  ;;  %2356 = vmatpush1.bf16.msra.mxu1 %v2616_v45 }
 0x1e6   :  { %v3047_v58 = vpop.f32.mrb[5].mxu0  ;;  %2357 = vmatprep.subr.bf16.mxu1 %v2615_v27  ;;  %v1354_v21 = vmul.f32 %v3044_v57, %v3044_v57 }
 0x1e7   :  { %1259 = vmatprep.mubr.f32.mxu1 %v3047_v58  ;;  %v1355_v20 = vmul.f32 %v3047_v58, %v3047_v58 }
 0x1e8   :  { %1260 = vmatmul.mubr.f32.gmra.mrb[36].mxu1 %v3044_v57 }
 0x1e9   :  { %v3052_v60 = vpop.f32.mrb[6].mxu0  ;;  %2358 = vmatpush1.bf16.msra.mxu1 %v2616_v45 }
 0x1ea   :  { %v3055_v19 = vpop.f32.mrb[7].mxu0  ;;  %2359 = vmatprep.subr.bf16.mxu1 %v2615_v27  ;;  %v1356_v3 = vmul.f32 %v3052_v60, %v3052_v60 }
 0x1eb   :  { %1264 = vmatprep.mubr.f32.mxu1 %v3055_v19  ;;  %v1357_v24 = vmul.f32 %v3055_v19, %v3055_v19 }
 0x1ec   :  { %1265 = vmatmul.mubr.f32.gmra.mrb[38].mxu1 %v3052_v60 }
 0x1ed   :  { %1269 = vmatprep.mubr.f32.mxu1 %v2966_v63  ;;  %2360 = vmatpush1.bf16.msra.mxu1 %v2616_v45 }
 0x1ee   :  { %2361 = vmatprep.subr.bf16.mxu1 %v2615_v27 }
 0x1f0   :  { %1270 = vmatmul.mubr.f32.gmra.mrb[40].mxu1 %v2964_v32 }
 0x1f1   :  { %1274 = vmatprep.mubr.f32.mxu1 %v2970_v39  ;;  %2362 = vmatpush1.bf16.msra.mxu1 %v2616_v45 }
 0x1f2   :  { %2363 = vmatprep.subr.bf16.mxu1 %v2615_v27 }
 0x1f4   :  { %1275 = vmatmul.mubr.f32.gmra.mrb[42].mxu1 %v2968_v6 }
 0x1f5   :  { %1279 = vmatprep.mubr.f32.mxu1 %v2974_v14  ;;  %2364 = vmatpush1.bf16.msra.mxu1 %v2616_v45 }
 0x1f6   :  { %2365 = vmatprep.subr.bf16.mxu1 %v2615_v27 }
 0x1f8   :  { %1280 = vmatmul.mubr.f32.gmra.mrb[44].mxu1 %v2972_v13 }
 0x1f9   :  { %1284 = vmatprep.mubr.f32.mxu1 %v2978_v16  ;;  %2366 = vmatpush1.bf16.msra.mxu1 %v2616_v45 }
 0x1fa   :  { %2367 = vmatprep.subr.bf16.mxu1 %v2615_v27 }
 0x1fc   :  { %1285 = vmatmul.mubr.f32.gmra.mrb[46].mxu1 %v2976_v47 }
 0x1fd   :  { %1289 = vmatprep.mubr.f32.mxu1 %v2982_v1  ;;  %2368 = vmatpush1.bf16.msra.mxu1 %v2616_v45 }
 0x1fe   :  { %2369 = vmatprep.subr.bf16.mxu1 %v2615_v27 }
 0x200   :  { %1290 = vmatmul.mubr.f32.gmra.mrb[48].mxu1 %v2980_v18 }
 0x201   :  { %1294 = vmatprep.mubr.f32.mxu1 %v2986_v52  ;;  %2370 = vmatpush1.bf16.msra.mxu1 %v2616_v45 }
 0x202   :  { %2371 = vmatprep.subr.bf16.mxu1 %v2615_v27 }
 0x204   :  { %1295 = vmatmul.mubr.f32.gmra.mrb[50].mxu1 %v2984_v7 }
 0x205   :  { %1299 = vmatprep.mubr.f32.mxu1 %v2990_v23  ;;  %2372 = vmatpush1.bf16.msra.mxu1 %v2616_v45 }
 0x206   :  { %2373 = vmatprep.subr.bf16.mxu1 %v2615_v27 }
 0x208   :  { %1300 = vmatmul.mubr.f32.gmra.mrb[52].mxu1 %v2988_v17 }
 0x209   :  { %1304 = vmatprep.mubr.f32.mxu1 %v2994_v2  ;;  %2374 = vmatpush1.bf16.msra.mxu1 %v2616_v45 }
 0x20a   :  { %2375 = vmatprep.subr.bf16.mxu1 %v2615_v27 }
 0x20c   :  { %1305 = vmatmul.mubr.f32.gmra.mrb[54].mxu1 %v2992_v41 }
 0x20d   :  { %1309 = vmatprep.mubr.f32.mxu1 %v2998_v5  ;;  %2376 = vmatpush1.bf16.msra.mxu1 %v2616_v45 }
 0x20e   :  { %2377 = vmatprep.subr.bf16.mxu1 %v2615_v27 }
 0x210   :  { %1310 = vmatmul.mubr.f32.gmra.mrb[56].mxu1 %v2996_v0 }
 0x211   :  { %1314 = vmatprep.mubr.f32.mxu1 %v3002_v26  ;;  %2378 = vmatpush1.bf16.msra.mxu1 %v2616_v45 }
 0x212   :  { %2379 = vmatprep.subr.bf16.mxu1 %v2615_v27 }
 0x214   :  { %1315 = vmatmul.mubr.f32.gmra.mrb[58].mxu1 %v3000_v22 }
 0x215   :  { %1319 = vmatprep.mubr.f32.mxu1 %v3006_v49  ;;  %2380 = vmatpush1.bf16.msra.mxu1 %v2616_v45 }
 0x216   :  { %2381 = vmatprep.subr.bf16.mxu1 %v2615_v27 }
 0x218   :  { %1320 = vmatmul.mubr.f32.gmra.mrb[60].mxu1 %v3004_v46 }
 0x219   :  { %1324 = vmatprep.mubr.f32.mxu1 %v3010_v61  ;;  %2382 = vmatpush1.bf16.msra.mxu1 %v2616_v45 }
 0x21a   :  { %2383 = vmatprep.subr.bf16.mxu1 %v2615_v27  ;;  %v1351_v27 = vmul.f32 %v3032_v54, %v3032_v54 }
 0x21c   :  { %1325 = vmatmul.mubr.f32.gmra.mrb[62].mxu1 %v3008_v36 }
 0x21d   :  { %1329 = vmatprep.mubr.f32.mxu1 %v3014_v4  ;;  %2384 = vmatpush1.bf16.msra.mxu1 %v2616_v45  ;;  %v1350_v45 = vmul.f32 %v3030_v59, %v3030_v59 }
 0x220   :  { %1330 = vmatmul.mubr.f32.gmra.mrb[64].mxu1 %v3012_v62 }
 0x221   :  { %1334 = vmatprep.mubr.f32.mxu1 %v3018_v10 }
 0x224   :  { %1335 = vmatmul.mubr.f32.gmra.mrb[66].mxu1 %v3016_v8 }
 0x225   :  { %1339 = vmatprep.mubr.f32.mxu1 %v3022_v15 }
 0x228   :  { %1340 = vmatmul.mubr.f32.gmra.mrb[68].mxu1 %v3020_v43 }
 0x229   :  { %1344 = vmatprep.mubr.f32.mxu1 %v3028_v53 }
 0x22c   :  { %1345 = vmatmul.mubr.f32.gmra.mrb[70].mxu1 %v3025_v55 }
 0x22d   :  { %1454 = vmatprep.mubr.f32.mxu1 %v1351_v27  ;;  %v1375_v27 = vmul.f32 %v2998_v5, %v2998_v5 }
 0x230   :  { %1455 = vmatmul.mubr.f32.vlgmr.msra.gmra.mrb[72].mxu1 %v1350_v45  ;;  %v1374_v45 = vmul.f32 %v2996_v0, %v2996_v0 }
 0x231   :  { %1459 = vmatprep.mubr.f32.mxu1 %v1353_v38  ;;  %v1377_v38 = vmul.f32 %v3002_v26, %v3002_v26 }
 0x234   :  { %1460 = vmatmul.mubr.f32.gmra.mrb[74].mxu1 %v1352_v51  ;;  %v1376_v51 = vmul.f32 %v3000_v22, %v3000_v22 }
 0x235   :  { %1464 = vmatprep.mubr.f32.mxu1 %v1355_v20  ;;  %v1379_v20 = vmul.f32 %v3006_v49, %v3006_v49 }
 0x238   :  { %1465 = vmatmul.mubr.f32.gmra.mrb[76].mxu1 %v1354_v21  ;;  %v1378_v21 = vmul.f32 %v3004_v46, %v3004_v46 }
 0x239   :  { %1469 = vmatprep.mubr.f32.mxu1 %v1357_v24  ;;  %v1381_v24 = vmul.f32 %v3010_v61, %v3010_v61 }
 0x23c   :  { %1470 = vmatmul.mubr.f32.gmra.mrb[78].mxu1 %v1356_v3  ;;  %v1380_v3 = vmul.f32 %v3008_v36, %v3008_v36 }
 0x23d   :  { %1474 = vmatprep.mubr.f32.mxu1 %v1359_v28  ;;  %v1383_v28 = vmul.f32 %v3014_v4, %v3014_v4 }
 0x240   :  { %1475 = vmatmul.mubr.f32.gmra.mrb[80].mxu1 %v1358_v29  ;;  %v1382_v29 = vmul.f32 %v3012_v62, %v3012_v62 }
 0x241   :  { %1479 = vmatprep.mubr.f32.mxu1 %v1361_v30  ;;  %v1385_v30 = vmul.f32 %v3018_v10, %v3018_v10 }
 0x244   :  { %1480 = vmatmul.mubr.f32.gmra.mrb[82].mxu1 %v1360_v31  ;;  %v1384_v31 = vmul.f32 %v3016_v8, %v3016_v8 }
 0x245   :  { %1484 = vmatprep.mubr.f32.mxu1 %v1363_v33  ;;  %v1387_v33 = vmul.f32 %v3022_v15, %v3022_v15 }
 0x248   :  { %1485 = vmatmul.mubr.f32.gmra.mrb[84].mxu1 %v1362_v34  ;;  %v1386_v34 = vmul.f32 %v3020_v43, %v3020_v43 }
 0x249   :  { %1489 = vmatprep.mubr.f32.mxu1 %v1365_v35  ;;  %v1389_v35 = vmul.f32 %v3028_v53, %v3028_v53 }
 0x24c   :  { %1490 = vmatmul.mubr.f32.gmra.mrb[86].mxu1 %v1364_v9  ;;  %v1388_v9 = vmul.f32 %v3025_v55, %v3025_v55 }
 0x24d   :  { %1494 = vmatprep.mubr.f32.mxu1 %v1367_v37  ;;  %v2617_v37 = vmov 0  }
 0x24e   :  { %2495 = vset.pattern.permute.xlu0 %v2617_v37  ;;  %2496 = vset.pattern.permute.xlu1 %v2617_v37 }
 0x250   :  { %1495 = vmatmul.mubr.f32.gmra.mrb[88].mxu1 %v1366_v11 }
 0x251   :  { %1499 = vmatprep.mubr.f32.mxu1 %v1369_v40 }
 0x254   :  { %1500 = vmatmul.mubr.f32.gmra.mrb[90].mxu1 %v1368_v42 }
 0x255   :  { %1504 = vmatprep.mubr.f32.mxu1 %v1371_v50 }
 0x258   :  { %1505 = vmatmul.mubr.f32.gmra.mrb[92].mxu1 %v1370_v25 }
 0x259   :  { %1509 = vmatprep.mubr.f32.mxu1 %v1373_v44 }
 0x25c   :  { %1510 = vmatmul.mubr.f32.gmra.mrb[94].mxu1 %v1372_v48 }
 0x25d   :  { %1514 = vmatprep.mubr.f32.mxu1 %v1375_v27 }
 0x260   :  { %1515 = vmatmul.mubr.f32.gmra.mrb[96].mxu1 %v1374_v45 }
 0x261   :  { %1519 = vmatprep.mubr.f32.mxu1 %v1377_v38 }
 0x264   :  { %1520 = vmatmul.mubr.f32.gmra.mrb[98].mxu1 %v1376_v51 }
 0x265   :  { %1524 = vmatprep.mubr.f32.mxu1 %v1379_v20 }
 0x268   :  { %1525 = vmatmul.mubr.f32.gmra.mrb[100].mxu1 %v1378_v21 }
 0x269   :  { %1529 = vmatprep.mubr.f32.mxu1 %v1381_v24 }
 0x26c   :  { %1530 = vmatmul.mubr.f32.gmra.mrb[102].mxu1 %v1380_v3 }
 0x26d   :  { %1534 = vmatprep.mubr.f32.mxu1 %v1383_v28 }
 0x270   :  { %1535 = vmatmul.mubr.f32.gmra.mrb[104].mxu1 %v1382_v29 }
 0x271   :  { %1539 = vmatprep.mubr.f32.mxu1 %v1385_v30 }
 0x274   :  { %1540 = vmatmul.mubr.f32.gmra.mrb[106].mxu1 %v1384_v31 }
 0x275   :  { %1544 = vmatprep.mubr.f32.mxu1 %v1387_v33 }
 0x278   :  { %1545 = vmatmul.mubr.f32.gmra.mrb[108].mxu1 %v1386_v34 }
 0x279   :  { %1549 = vmatprep.mubr.f32.mxu1 %v1389_v35 }
 0x27c   :  { %1550 = vmatmul.mubr.f32.gmra.mrb[110].mxu1 %v1388_v9 }
 0x2b3   :  { %v1251_v11 = vpop.f32.mrb[32].mxu1 }
 0x2b4   :  { %v1253_v40 = vpop.f32.mrb[33].mxu1 }
 0x2b7   :  { %v1256_v42 = vpop.f32.mrb[34].mxu1 }
 0x2b8   :  { %v1258_v50 = vpop.f32.mrb[35].mxu1  ;;  %v3227_v8 = vmul.f32 0.0051020407, %v1256_v42 }
 0x2bb   :  { %v1261_v25 = vpop.f32.mrb[36].mxu1 }
 0x2bc   :  { %v1263_v44 = vpop.f32.mrb[37].mxu1  ;;  %v3229_v62 = vmul.f32 0.0051020407, %v1261_v25 }
 0x2bf   :  { %v1266_v48 = vpop.f32.mrb[38].mxu1 }
 0x2c0   :  { %v1268_v27 = vpop.f32.mrb[39].mxu1  ;;  %v3235_v42 = vmul.f32 0.0051020407, %v1266_v48  ;;  %v1695_v48 = vld [vmem:[%s3515_s3] sm:$0xff] }
 0x2c3   :  { %v1271_v45 = vpop.f32.mrb[40].mxu1 }
 0x2c4   :  { %v1273_v38 = vpop.f32.mrb[41].mxu1  ;;  %v3237_v26 = vmul.f32 0.0051020407, %v1271_v45 }
 0x2c7   :  { %v3197_v51 = vpop.f32.mrb[42].mxu1 }
 0x2c8   :  { %v1278_v20 = vpop.f32.mrb[43].mxu1  ;;  %v3247_v45 = vmul.f32 0.0051020407, %v3197_v51 }
 0x2cb   :  { %v3199_v21 = vpop.f32.mrb[44].mxu1 }
 0x2cc   :  { %v1283_v24 = vpop.f32.mrb[45].mxu1 }
 0x2cf   :  { %v3201_v3 = vpop.f32.mrb[46].mxu1 }
 0x2d0   :  { %v1288_v28 = vpop.f32.mrb[47].mxu1 }
 0x2d3   :  { %v3203_v29 = vpop.f32.mrb[48].mxu1 }
 0x2d4   :  { %v1293_v30 = vpop.f32.mrb[49].mxu1 }
 0x2d7   :  { %v3205_v31 = vpop.f32.mrb[50].mxu1 }
 0x2d8   :  { %v1298_v33 = vpop.f32.mrb[51].mxu1 }
 0x2db   :  { %v3207_v34 = vpop.f32.mrb[52].mxu1 }
 0x2dc   :  { %v1303_v35 = vpop.f32.mrb[53].mxu1 }
 0x2df   :  { %v3209_v9 = vpop.f32.mrb[54].mxu1 }
 0x2e0   :  { %v1308_v37 = vpop.f32.mrb[55].mxu1 }
 0x2e3   :  { %v3211_v40 = vpop.f32.mrb[56].mxu1 }
 0x2e4   :  { %v1313_v50 = vpop.f32.mrb[57].mxu1 }
 0x2e5   :  { %v1555_v50 = vmul.f32 0.0051020407, %v1251_v11 }
 0x2e7   :  { %v3213_v44 = vpop.f32.mrb[58].mxu1  ;;  %v1595_v10 = vmul.f32 %v1555_v50, %v1555_v50 }
 0x2e8   :  { %v1318_v27 = vpop.f32.mrb[59].mxu1 }
 0x2eb   :  { %v3215_v38 = vpop.f32.mrb[60].mxu1 }
 0x2ec   :  { %v1323_v20 = vpop.f32.mrb[61].mxu1 }
 0x2ef   :  { %v3217_v24 = vpop.f32.mrb[62].mxu1 }
 0x2f0   :  { %v1328_v28 = vpop.f32.mrb[63].mxu1 }
 0x2f3   :  { %v3219_v30 = vpop.f32.mrb[64].mxu1 }
 0x2f4   :  { %v1333_v33 = vpop.f32.mrb[65].mxu1 }
 0x2f7   :  { %v3221_v53 = vpop.f32.mrb[66].mxu1 }
 0x2f8   :  { %v1338_v35 = vpop.f32.mrb[67].mxu1 }
 0x2f9   :  { %v1596_v35 = vmul.f32 %v3227_v8, %v3227_v8 }
 0x2fb   :  { %v3223_v55 = vpop.f32.mrb[68].mxu1 }
 0x2fc   :  { %v1343_v37 = vpop.f32.mrb[69].mxu1 }
 0x2ff   :  { %v3225_v15 = vpop.f32.mrb[70].mxu1 }
 0x300   :  { %v1348_v43 = vpop.f32.mrb[71].mxu1 }
 0x301   :  { %v1597_v43 = vmul.f32 %v3229_v62, %v3229_v62 }
 0x303   :  { %v1456_v27 = vpop.f32.mrb[72].mxu1 }
 0x304   :  { %v1575_v20 = vmul.f32 0.0051020407, %v1456_v27  ;;  %v1458_v4 = vpop.f32.mrb[73].mxu1 }
 0x306   :  { %v1615_v28 = vsub.f32 %v1575_v20, %v1595_v10 }
 0x307   :  { %v1461_v33 = vpop.f32.mrb[74].mxu1 }
 0x308   :  { %v1635_v61 = vmax.f32 %v1615_v28, 0.0  ;;  %v1576_v36 = vmul.f32 0.0051020407, %v1461_v33  ;;  %v1463_v37 = vpop.f32.mrb[75].mxu1  ;;  %v1598_v28 = vmul.f32 %v3235_v42, %v3235_v42 }
 0x30a   :  { %v1655_v49 = vadd.f32 1e-05, %v1635_v61  ;;  %v1616_v46 = vsub.f32 %v1576_v36, %v1596_v35 }
 0x30b   :  { %v1466_v11 = vpop.f32.mrb[76].mxu1 }
 0x30c   :  { %2497 = vrsqrt.f32 %v1655_v49  ;;  %v1636_v4 = vmax.f32 %v1616_v46, 0.0  ;;  %v1577_v10 = vmul.f32 0.0051020407, %v1466_v11  ;;  %v1468_v25 = vpop.f32.mrb[77].mxu1  ;;  %v1599_v49 = vmul.f32 %v3237_v26, %v3237_v26 }
 0x30e   :  { %v1656_v27 = vadd.f32 1e-05, %v1636_v4  ;;  %v1617_v20 = vsub.f32 %v1577_v10, %v1597_v43 }
 0x30f   :  { %v1471_v22 = vpop.f32.mrb[78].mxu1 }
 0x310   :  { %2499 = vrsqrt.f32 %v1656_v27  ;;  %v1637_v36 = vmax.f32 %v1617_v20, 0.0  ;;  %v1578_v61 = vmul.f32 0.0051020407, %v1471_v22  ;;  %v1473_v33 = vpop.f32.mrb[79].mxu1  ;;  %v3250_v27 = vmul.f32 0.0051020407, %v3199_v21 }
 0x312   :  { %v1657_v35 = vadd.f32 1e-05, %v1637_v36  ;;  %v1618_v37 = vsub.f32 %v1578_v61, %v1598_v28  ;;  %v1600_v36 = vmul.f32 %v3247_v45, %v3247_v45  ;;  %v1601_v21 = vmul.f32 %v3250_v27, %v3250_v27 }
 0x313   :  { %v1476_v46 = vpop.f32.mrb[80].mxu1 }
 0x314   :  { %2501 = vrsqrt.f32 %v1657_v35  ;;  %v1638_v43 = vmax.f32 %v1618_v37, 0.0  ;;  %v1579_v11 = vmul.f32 0.0051020407, %v1476_v46  ;;  %v1478_v4 = vpop.f32.mrb[81].mxu1  ;;  %v1696_v35 = vld [vmem:[%s3515_s3 + $0x8] sm:$0xff] }
 0x315   :  { %v1735_v4 = vld [vmem:[%s3516_s4] sm:$0xff] }
 0x316   :  { %v2498_v10 = vpop.eup %2497  ;;  %v1658_v22 = vadd.f32 1e-05, %v1638_v43  ;;  %v1619_v25 = vsub.f32 %v1579_v11, %v1599_v49 }
 0x317   :  { %v1481_v20 = vpop.f32.mrb[82].mxu1  ;;  %v1715_v28 = vmul.f32 %v2498_v10, %v1695_v48  ;;  %v1697_v10 = vld [vmem:[%s3515_s3 + $0x10] sm:$0xff] }
 0x318   :  { %2503 = vrsqrt.f32 %v1658_v22  ;;  %v1639_v61 = vmax.f32 %v1619_v25, 0.0  ;;  %v1580_v33 = vmul.f32 0.0051020407, %v1481_v20  ;;  %v1483_v51 = vpop.f32.mrb[83].mxu1  ;;  %v3266_v22 = vmul.f32 0.0051020407, %v3201_v3 }
 0x319   :  { %1797 = vperm.xlu0 %2495, %v1715_v28   ;;  %v1755_v37 = vmul.f32 %v1715_v28, %v1555_v50  ;;  %v3270_v51 = vmul.f32 0.0051020407, %v3203_v29  ;;  %v1736_v3 = vld [vmem:[%s3516_s4 + $0x8] sm:$0xff]  ;;  %v1698_v29 = vld [vmem:[%s3515_s3 + $0x18] sm:$0xff] }
 0x31a   :  { %v2500_v46 = vpop.eup %2499  ;;  %v1659_v49 = vadd.f32 1e-05, %v1639_v61  ;;  %v1620_v43 = vsub.f32 %v1580_v33, %v1600_v36 }
 0x31b   :  { %v1486_v48 = vpop.f32.mrb[84].mxu1  ;;  %v1716_v11 = vmul.f32 %v2500_v46, %v1696_v35  ;;  %v1775_v46 = vsub.f32 %v1735_v4, %v1755_v37 }
 0x31c   :  { %2505 = vrsqrt.f32 %v1659_v49  ;;  %v1640_v50 = vmax.f32 %v1620_v43, 0.0  ;;  %v1581_v25 = vmul.f32 0.0051020407, %v1486_v48  ;;  %v1488_v20 = vpop.f32.mrb[85].mxu1  ;;  %v1602_v49 = vmul.f32 %v3266_v22, %v3266_v22 }
 0x31d   :  { %1802 = vperm.xlu0 %2495, %v1716_v11   ;;  %v1756_v28 = vmul.f32 %v1716_v11, %v3227_v8 }
 0x31e   :  { %v2502_v36 = vpop.eup %2501  ;;  %v1660_v61 = vadd.f32 1e-05, %v1640_v50  ;;  %v1621_v33 = vsub.f32 %v1581_v25, %v1601_v21  ;;  %v1737_v21 = vld [vmem:[%s3516_s4 + $0x10] sm:$0xff]  ;;  %v1603_v50 = vmul.f32 %v3270_v51, %v3270_v51 }
 0x31f   :  { %v1491_v35 = vpop.f32.mrb[86].mxu1  ;;  %v1717_v5 = vmul.f32 %v2502_v36, %v1697_v10  ;;  %v1776_v20 = vsub.f32 %v1736_v3, %v1756_v28  ;;  %v3294_v3 = vmul.f32 0.0051020407, %v3207_v34  ;;  %v1700_v34 = vld [vmem:[%s3515_s3 + $0x28] sm:$0xff] }
 0x320   :  { %2507 = vrsqrt.f32 %v1660_v61  ;;  %v1641_v43 = vmax.f32 %v1621_v33, 0.0  ;;  %v1582_v48 = vmul.f32 0.0051020407, %v1491_v35  ;;  %v1493_v8 = vpop.f32.mrb[87].mxu1  ;;  %v1699_v33 = vld [vmem:[%s3515_s3 + $0x20] sm:$0xff] }
 0x321   :  { %1937 = vperm.xlu0 %2495, %v1775_v46   ;;  %1807 = vperm.xlu1 %2496, %v1717_v5   ;;  %v1757_v37 = vmul.f32 %v1717_v5, %v3229_v62  ;;  %v3290_v35 = vmul.f32 0.0051020407, %v3205_v31  ;;  %v1738_v31 = vld [vmem:[%s3516_s4 + $0x18] sm:$0xff] }
 0x322   :  { %v2504_v11 = vpop.eup %2503  ;;  %v1661_v4 = vadd.f32 1e-05, %v1641_v43  ;;  %v1622_v10 = vsub.f32 %v1582_v48, %v1602_v49 }
 0x323   :  { %v1496_v25 = vpop.f32.mrb[88].mxu1  ;;  %v1777_v36 = vsub.f32 %v1737_v21, %v1757_v37  ;;  %v1718_v61 = vmul.f32 %v2504_v11, %v1698_v29  ;;  %v1604_v29 = vmul.f32 %v3290_v35, %v3290_v35 }
 0x324   :  { %2509 = vrsqrt.f32 %v1661_v4  ;;  %v1642_v46 = vmax.f32 %v1622_v10, 0.0  ;;  %v1583_v5 = vmul.f32 0.0051020407, %v1496_v25  ;;  %v1498_v62 = vpop.f32.mrb[89].mxu1 }
 0x325   :  { %1942 = vperm.xlu1 %2496, %v1776_v20   ;;  %1947 = vperm.xlu0 %2495, %v1777_v36   ;;  %v1758_v49 = vmul.f32 %v1718_v61, %v3235_v42  ;;  %v1739_v42 = vld [vmem:[%s3516_s4 + $0x20] sm:$0xff]  ;;  %v1605_v36 = vmul.f32 %v3294_v3, %v3294_v3 }
 0x326   :  { %v2506_v43 = vpop.eup %2505  ;;  %v1662_v48 = vadd.f32 1e-05, %v1642_v46  ;;  %v1623_v28 = vsub.f32 %v1583_v5, %v1603_v50 }
 0x327   :  { %v1501_v8 = vpop.f32.mrb[90].mxu1  ;;  %v1719_v21 = vmul.f32 %v2506_v43, %v1699_v33  ;;  %v1778_v46 = vsub.f32 %v1738_v31, %v1758_v49  ;;  %v1701_v43 = vld [vmem:[%s3515_s3 + $0x30] sm:$0xff]  ;;  %v3318_v31 = vmul.f32 0.0051020407, %v3211_v40  ;;  %v1702_v40 = vld [vmem:[%s3515_s3 + $0x38] sm:$0xff] }
 0x328   :  { %2511 = vrsqrt.f32 %v1662_v48  ;;  %v1643_v37 = vmax.f32 %v1623_v28, 0.0  ;;  %v1584_v11 = vmul.f32 0.0051020407, %v1501_v8  ;;  %v1503_v4 = vpop.f32.mrb[91].mxu1  ;;  %v3314_v48 = vmul.f32 0.0051020407, %v3209_v9 }
 0x329   :  { %1812 = vperm.xlu1 %2496, %v1718_v61   ;;  %1817 = vperm.xlu0 %2495, %v1719_v21   ;;  %v1759_v10 = vmul.f32 %v1719_v21, %v3237_v26  ;;  %v1740_v9 = vld [vmem:[%s3516_s4 + $0x28] sm:$0xff] }
 0x32a   :  { %v2508_v50 = vpop.eup %2507  ;;  %v1663_v25 = vadd.f32 1e-05, %v1643_v37  ;;  %v1624_v20 = vsub.f32 %v1584_v11, %v1604_v29  ;;  %v1606_v4 = vmul.f32 %v3314_v48, %v3314_v48 }
 0x32b   :  { %v1506_v33 = vpop.f32.mrb[92].mxu1  ;;  %v1779_v5 = vsub.f32 %v1739_v42, %v1759_v10  ;;  %v1720_v62 = vmul.f32 %v2508_v50, %v1700_v34 }
 0x32c   :  { %2513 = vrsqrt.f32 %v1663_v25  ;;  %v1644_v61 = vmax.f32 %v1624_v20, 0.0  ;;  %v1585_v26 = vmul.f32 0.0051020407, %v1506_v33  ;;  %v1508_v28 = vpop.f32.mrb[93].mxu1  ;;  %v1607_v33 = vmul.f32 %v3318_v31, %v3318_v31 }
 0x32d   :  { %1952 = vperm.xlu1 %2496, %v1778_v46   ;;  %1957 = vperm.xlu0 %2495, %v1779_v5   ;;  %v1760_v8 = vmul.f32 %v1720_v62, %v3247_v45  ;;  %v1741_v45 = vld [vmem:[%s3516_s4 + $0x30] sm:$0xff]  ;;  %v3338_v28 = vmul.f32 0.0051020407, %v3213_v44  ;;  %v1742_v44 = vld [vmem:[%s3516_s4 + $0x38] sm:$0xff] }
 0x32e   :  { %v2510_v21 = vpop.eup %2509  ;;  %v1664_v29 = vadd.f32 1e-05, %v1644_v61  ;;  %v1625_v49 = vsub.f32 %v1585_v26, %v1605_v36  ;;  %v1703_v26 = vld [vmem:[%s3515_s3 + $0x40] sm:$0xff] }
 0x32f   :  { %v1511_v37 = vpop.f32.mrb[94].mxu1  ;;  %v1721_v11 = vmul.f32 %v2510_v21, %v1701_v43  ;;  %v1780_v5 = vsub.f32 %v1740_v9, %v1760_v8 }
 0x330   :  { %2515 = vrsqrt.f32 %v1664_v29  ;;  %v1645_v42 = vmax.f32 %v1625_v49, 0.0  ;;  %v1586_v34 = vmul.f32 0.0051020407, %v1511_v37  ;;  %v1513_v10 = vpop.f32.mrb[95].mxu1 }
 0x331   :  { %1822 = vperm.xlu1 %2496, %v1720_v62   ;;  %1827 = vperm.xlu0 %2495, %v1721_v11   ;;  %v1761_v50 = vmul.f32 %v1721_v11, %v3250_v27  ;;  %v3342_v11 = vmul.f32 0.0051020407, %v3215_v38  ;;  %v1704_v38 = vld [vmem:[%s3515_s3 + $0x48] sm:$0xff] }
 0x332   :  { %v2512_v25 = vpop.eup %2511  ;;  %v1665_v20 = vadd.f32 1e-05, %v1645_v42  ;;  %v1626_v36 = vsub.f32 %v1586_v34, %v1606_v4  ;;  %v1608_v42 = vmul.f32 %v3338_v28, %v3338_v28 }
 0x333   :  { %v1516_v46 = vpop.f32.mrb[96].mxu1  ;;  %v1781_v43 = vsub.f32 %v1741_v45, %v1761_v50  ;;  %v1722_v61 = vmul.f32 %v2512_v25, %v1702_v40 }
 0x334   :  { %2517 = vrsqrt.f32 %v1665_v20  ;;  %v1646_v62 = vmax.f32 %v1626_v36, 0.0  ;;  %v1587_v27 = vmul.f32 0.0051020407, %v1516_v46  ;;  %v1518_v21 = vpop.f32.mrb[97].mxu1  ;;  %v1609_v36 = vmul.f32 %v3342_v11, %v3342_v11 }
 0x335   :  { %1962 = vperm.xlu1 %2496, %v1780_v5   ;;  %1967 = vperm.xlu0 %2495, %v1781_v43   ;;  %v1762_v29 = vmul.f32 %v1722_v61, %v3266_v22  ;;  %v1743_v22 = vld [vmem:[%s3516_s4 + $0x40] sm:$0xff] }
 0x336   :  { %v2514_v49 = vpop.eup %2513  ;;  %v1666_v37 = vadd.f32 1e-05, %v1646_v62  ;;  %v1627_v8 = vsub.f32 %v1587_v27, %v1607_v33  ;;  %v3362_v62 = vmul.f32 0.0051020407, %v3217_v24  ;;  %v1744_v24 = vld [vmem:[%s3516_s4 + $0x48] sm:$0xff] }
 0x337   :  { %v1521_v9 = vpop.f32.mrb[98].mxu1  ;;  %v1723_v4 = vmul.f32 %v2514_v49, %v1703_v26  ;;  %v1782_v46 = vsub.f32 %v1742_v44, %v1762_v29  ;;  %v1705_v26 = vld [vmem:[%s3515_s3 + $0x50] sm:$0xff] }
 0x338   :  { %2519 = vrsqrt.f32 %v1666_v37  ;;  %v1647_v34 = vmax.f32 %v1627_v8, 0.0  ;;  %v1588_v10 = vmul.f32 0.0051020407, %v1521_v9  ;;  %v1523_v45 = vpop.f32.mrb[99].mxu1  ;;  %v3366_v8 = vmul.f32 0.0051020407, %v3219_v30 }
 0x339   :  { %1832 = vperm.xlu1 %2496, %v1722_v61   ;;  %1837 = vperm.xlu0 %2495, %v1723_v4   ;;  %v1763_v40 = vmul.f32 %v1723_v4, %v3270_v51  ;;  %v1610_v44 = vmul.f32 %v3362_v62, %v3362_v62  ;;  %v1706_v30 = vld [vmem:[%s3515_s3 + $0x58] sm:$0xff] }
 0x33a   :  { %v2516_v50 = vpop.eup %2515  ;;  %v1667_v25 = vadd.f32 1e-05, %v1647_v34  ;;  %v1628_v20 = vsub.f32 %v1588_v10, %v1608_v42 }
 0x33b   :  { %v1526_v33 = vpop.f32.mrb[100].mxu1  ;;  %v1783_v5 = vsub.f32 %v1743_v22, %v1763_v40  ;;  %v1724_v43 = vmul.f32 %v2516_v50, %v1704_v38  ;;  %v1611_v50 = vmul.f32 %v3366_v8, %v3366_v8 }
 0x33c   :  { %2521 = vrsqrt.f32 %v1667_v25  ;;  %v1648_v61 = vmax.f32 %v1628_v20, 0.0  ;;  %v1589_v51 = vmul.f32 0.0051020407, %v1526_v33  ;;  %v1528_v27 = vpop.f32.mrb[101].mxu1 }
 0x33d   :  { %1972 = vperm.xlu1 %2496, %v1782_v46   ;;  %1977 = vperm.xlu0 %2495, %v1783_v5   ;;  %v1764_v21 = vmul.f32 %v1724_v43, %v3290_v35  ;;  %v1745_v35 = vld [vmem:[%s3516_s4 + $0x50] sm:$0xff]  ;;  %v1707_v46 = vld [vmem:[%s3515_s3 + $0x60] sm:$0xff]  ;;  %v3386_v5 = vmul.f32 0.0051020407, %v3221_v53  ;;  %v1746_v53 = vld [vmem:[%s3516_s4 + $0x58] sm:$0xff] }
 0x33e   :  { %v2518_v49 = vpop.eup %2517  ;;  %v1668_v37 = vadd.f32 1e-05, %v1648_v61  ;;  %v1629_v29 = vsub.f32 %v1589_v51, %v1609_v36 }
 0x33f   :  { %v1531_v9 = vpop.f32.mrb[102].mxu1  ;;  %v1725_v4 = vmul.f32 %v2518_v49, %v1705_v26  ;;  %v1784_v20 = vsub.f32 %v1744_v24, %v1764_v21  ;;  %v3390_v49 = vmul.f32 0.0051020407, %v3223_v55  ;;  %v1708_v55 = vld [vmem:[%s3515_s3 + $0x68] sm:$0xff] }
 0x340   :  { %2523 = vrsqrt.f32 %v1668_v37  ;;  %v1649_v42 = vmax.f32 %v1629_v29, 0.0  ;;  %v1590_v34 = vmul.f32 0.0051020407, %v1531_v9  ;;  %v1533_v10 = vpop.f32.mrb[103].mxu1  ;;  %v1612_v9 = vmul.f32 %v3386_v5, %v3386_v5 }
 0x341   :  { %1842 = vperm.xlu1 %2496, %v1724_v43   ;;  %1847 = vperm.xlu0 %2495, %v1725_v4   ;;  %v1765_v45 = vmul.f32 %v1725_v4, %v3294_v3 }
 0x342   :  { %v2520_v22 = vpop.eup %2519  ;;  %v1669_v38 = vadd.f32 1e-05, %v1649_v42  ;;  %v1630_v40 = vsub.f32 %v1590_v34, %v1610_v44 }
 0x343   :  { %v1536_v25 = vpop.f32.mrb[104].mxu1  ;;  %v1785_v36 = vsub.f32 %v1745_v35, %v1765_v45  ;;  %v1726_v33 = vmul.f32 %v2520_v22, %v1706_v30  ;;  %v1613_v30 = vmul.f32 %v3390_v49, %v3390_v49 }
 0x344   :  { %2525 = vrsqrt.f32 %v1669_v38  ;;  %v1650_v43 = vmax.f32 %v1630_v40, 0.0  ;;  %v1591_v3 = vmul.f32 0.0051020407, %v1536_v25  ;;  %v1538_v26 = vpop.f32.mrb[105].mxu1  ;;  %v3410_v25 = vmul.f32 0.0051020407, %v3225_v15 }
 0x345   :  { %1982 = vperm.xlu1 %2496, %v1784_v20   ;;  %1987 = vperm.xlu0 %2495, %v1785_v36   ;;  %v1766_v61 = vmul.f32 %v1726_v33, %v3314_v48  ;;  %v1747_v48 = vld [vmem:[%s3516_s4 + $0x60] sm:$0xff] }
 0x346   :  { %v2522_v51 = vpop.eup %2521  ;;  %v1670_v27 = vadd.f32 1e-05, %v1650_v43  ;;  %v1631_v21 = vsub.f32 %v1591_v3, %v1611_v50  ;;  %v1709_v50 = vld [vmem:[%s3515_s3 + $0x70] sm:$0xff]  ;;  %v1614_v15 = vmul.f32 %v3410_v25, %v3410_v25 }
 0x347   :  { %v1541_v37 = vpop.f32.mrb[106].mxu1  ;;  %v1727_v29 = vmul.f32 %v2522_v51, %v1707_v46  ;;  %v1786_v22 = vsub.f32 %v1746_v53, %v1766_v61  ;;  %v1748_v51 = vld [vmem:[%s3516_s4 + $0x68] sm:$0xff] }
 0x348   :  { %2527 = vrsqrt.f32 %v1670_v27  ;;  %v1651_v4 = vmax.f32 %v1631_v21, 0.0  ;;  %v1592_v24 = vmul.f32 0.0051020407, %v1541_v37  ;;  %v1543_v44 = vpop.f32.mrb[107].mxu1 }
 0x349   :  { %1852 = vperm.xlu1 %2496, %v1726_v33   ;;  %1857 = vperm.xlu0 %2495, %v1727_v29   ;;  %v1767_v42 = vmul.f32 %v1727_v29, %v3318_v31  ;;  %v1710_v29 = vld [vmem:[%s3515_s3 + $0x78] sm:$0xff] }
 0x34a   :  { %v2524_v34 = vpop.eup %2523  ;;  %v1671_v10 = vadd.f32 1e-05, %v1651_v4  ;;  %v1632_v35 = vsub.f32 %v1592_v24, %v1612_v9 }
 0x34b   :  { %v1546_v45 = vpop.f32.mrb[108].mxu1  ;;  %v1787_v38 = vsub.f32 %v1747_v48, %v1767_v42  ;;  %v1728_v40 = vmul.f32 %v2524_v34, %v1708_v55  ;;  %v1711_v34 = vld [vmem:[%s3515_s3 + $0x80] sm:$0xff] }
 0x34c   :  { %2529 = vrsqrt.f32 %v1671_v10  ;;  %v1652_v20 = vmax.f32 %v1632_v35, 0.0  ;;  %v1593_v31 = vmul.f32 0.0051020407, %v1546_v45  ;;  %v1548_v36 = vpop.f32.mrb[109].mxu1 }
 0x34d   :  { %1992 = vperm.xlu1 %2496, %v1786_v22   ;;  %1997 = vperm.xlu0 %2495, %v1787_v38   ;;  %v1768_v33 = vmul.f32 %v1728_v40, %v3338_v28  ;;  %v1749_v28 = vld [vmem:[%s3516_s4 + $0x70] sm:$0xff]  ;;  %v1751_v22 = vld [vmem:[%s3516_s4 + $0x80] sm:$0xff]  ;;  %v1712_v38 = vld [vmem:[%s3515_s3 + $0x88] sm:$0xff] }
 0x34e   :  { %v2526_v46 = vpop.eup %2525  ;;  %v1672_v43 = vadd.f32 1e-05, %v1652_v20  ;;  %v1633_v3 = vsub.f32 %v1593_v31, %v1613_v30  ;;  %v1713_v36 = vld [vmem:[%s3515_s3 + $0x90] sm:$0xff] }
 0x34f   :  { %v1551_v26 = vpop.f32.mrb[110].mxu1  ;;  %v1729_v61 = vmul.f32 %v2526_v46, %v1709_v50  ;;  %v1788_v44 = vsub.f32 %v1748_v51, %v1768_v33 }
 0x350   :  { %2531 = vrsqrt.f32 %v1672_v43  ;;  %v1653_v27 = vmax.f32 %v1633_v3, 0.0  ;;  %v1594_v21 = vmul.f32 0.0051020407, %v1551_v26  ;;  %v1553_v37 = vpop.f32.mrb[111].mxu1  ;;  %v1752_v3 = vld [vmem:[%s3516_s4 + $0x88] sm:$0xff]  ;;  %v1714_v26 = vld [vmem:[%s3515_s3 + $0x98] sm:$0xff] }
 0x351   :  { %1862 = vperm.xlu1 %2496, %v1728_v40   ;;  %1867 = vperm.xlu0 %2495, %v1729_v61   ;;  %v1769_v53 = vmul.f32 %v1729_v61, %v3342_v11  ;;  %v1750_v11 = vld [vmem:[%s3516_s4 + $0x78] sm:$0xff]  ;;  %s2618_s3 = smov [#allocation7]  }
 0x352   :  { %v2528_v9 = vpop.eup %2527  ;;  %v1673_v4 = vadd.f32 1e-05, %v1653_v27  ;;  %v1634_v24 = vsub.f32 %v1594_v21, %v1614_v15  ;;  %v1754_v37 = vld [vmem:[%s3516_s4 + $0x98] sm:$0xff] }
 0x353   :  { %v1789_v48 = vsub.f32 %v1749_v28, %v1769_v53  ;;  %v1730_v55 = vmul.f32 %v2528_v9, %v1710_v29 }
 0x354   :  { %2533 = vrsqrt.f32 %v1673_v4  ;;  %v1654_v42 = vmax.f32 %v1634_v24, 0.0 }
 0x355   :  { %2002 = vperm.xlu1 %2496, %v1788_v44   ;;  %2007 = vperm.xlu0 %2495, %v1789_v48   ;;  %v1770_v10 = vmul.f32 %v1730_v55, %v3362_v62 }
 0x356   :  { %v2530_v35 = vpop.eup %2529  ;;  %v1674_v30 = vadd.f32 1e-05, %v1654_v42 }
 0x357   :  { %v1731_v45 = vmul.f32 %v2530_v35, %v1711_v34  ;;  %v1790_v50 = vsub.f32 %v1750_v11, %v1770_v10 }
 0x358   :  { %2535 = vrsqrt.f32 %v1674_v30 }
 0x359   :  { %1872 = vperm.xlu1 %2496, %v1730_v55   ;;  %1877 = vperm.xlu0 %2495, %v1731_v45   ;;  %v1771_v62 = vmul.f32 %v1731_v45, %v3366_v8  ;;  %v1753_v8 = vld [vmem:[%s3516_s4 + $0x90] sm:$0xff]  ;;  %s2120_s4 = sshll.u32 %s2618_s3, 4  ;;  %s2121_s4 = int_to_ptr.vmem [resolvable:$true] %s2120_s4 }
 0x35a   :  { %v2532_v40 = vpop.eup %2531  ;;  %s2581_s22 = scalar_lea.vmem %s2121_s4, 5120  ;;  %p2586_p3 = scmp.lt.s32.totalorder %s2121_s4, %s2121_s4 }
 0x35b   :  { %v1791_v20 = vsub.f32 %v1751_v22, %v1771_v62  ;;  %v1732_v31 = vmul.f32 %v2532_v40, %v1712_v38  ;;  %p2582_p2 = scmp.ne.s32.totalorder %s2121_s4, %s2581_s22  ;;  %p2587_p4 = scmp.lt.s32.totalorder %s2581_s22, %s2581_s22 }
 0x35d   :  { %2012 = vperm.xlu1 %2496, %v1790_v50   ;;  %2017 = vperm.xlu0 %2495, %v1791_v20   ;;  %v1772_v33 = vmul.f32 %v1732_v31, %v3386_v5  ;;  %p2588_p5 = por %p2587_p4, %p2586_p3 }
 0x35e   :  { %v2534_v46 = vpop.eup %2533 }
 0x35f   :  { %v1733_v43 = vmul.f32 %v2534_v46, %v1713_v36  ;;  %v1792_v5 = vsub.f32 %v1752_v3, %v1772_v33  ;;  %p2589_p6 = pnand %p2588_p5, %p2582_p2 }
 0x361   :  { %1882 = vperm.xlu1 %2496, %v1732_v31   ;;  %1887 = vperm.xlu0 %2495, %v1733_v43   ;;  %v1773_v61 = vmul.f32 %v1733_v43, %v3390_v49 }
 0x362   :  { %v2536_v51 = vpop.eup %2535 }
 0x363   :  { %v1793_v15 = vsub.f32 %v1753_v8, %v1773_v61  ;;  %v1734_v27 = vmul.f32 %v2536_v51, %v1714_v26 }
 0x365   :  { %2022 = vperm.xlu1 %2496, %v1792_v5   ;;  %2027 = vperm.xlu0 %2495, %v1793_v15   ;;  %v1774_v21 = vmul.f32 %v1734_v27, %v3410_v25 }
 0x367   :  { %v1794_v28 = vsub.f32 %v1754_v37, %v1774_v21 }
 0x369   :  { %1892 = vperm.xlu1 %2496, %v1734_v27  }
 0x36d   :  { %2032 = vperm.xlu1 %2496, %v1794_v28  }
 0x398   :  { %v1798_v29 = vpop.permute.xlu0 %1797 }
 0x399   :  { %v1895_v9 = vmul.f32 %v1798_v29, %v3030_v59  ;;  %v1896_v49 = vmul.f32 %v1798_v29, %v3032_v54 }
 0x39c   :  { %v1803_v53 = vpop.permute.xlu0 %1802 }
 0x39d   :  { %v1897_v55 = vmul.f32 %v1803_v53, %v3036_v12  ;;  %v1898_v25 = vmul.f32 %v1803_v53, %v3039_v56 }
 0x3a0   :  { %v1938_v4 = vpop.permute.xlu0 %1937  ;;  %v1808_v24 = vpop.permute.xlu1 %1807 }
 0x3a1   :  { %v2035_v44 = vadd.f32 %v1938_v4, %v1895_v9  ;;  %v2036_v48 = vadd.f32 %v1938_v4, %v1896_v49  ;;  %v1899_v42 = vmul.f32 %v1808_v24, %v3044_v57  ;;  %v1900_v34 = vmul.f32 %v1808_v24, %v3047_v58 }
 0x3a3   :  { %2075 = vst [vmem:[#allocation7] sm:$0xff] %v2035_v44  ;;  %2076 = vst [vmem:[#allocation7 + $0x8] sm:$0xff] %v2036_v48 }
 0x3a4   :  { %v1943_v10 = vpop.permute.xlu1 %1942  ;;  %v1948_v35 = vpop.permute.xlu0 %1947 }
 0x3a5   :  { %v2037_v30 = vadd.f32 %v1943_v10, %v1897_v55  ;;  %v2038_v59 = vadd.f32 %v1943_v10, %v1898_v25  ;;  %v2039_v45 = vadd.f32 %v1948_v35, %v1899_v42  ;;  %v2040_v54 = vadd.f32 %v1948_v35, %v1900_v34  ;;  %v3548_v34 = vld [vmem:[#allocation11_spill] sm:$0xff] }
 0x3a7   :  { %2077 = vst [vmem:[#allocation7 + $0x10] sm:$0xff] %v2037_v30  ;;  %2078 = vst [vmem:[#allocation7 + $0x18] sm:$0xff] %v2038_v59 }
 0x3a8   :  { %2079 = vst [vmem:[#allocation7 + $0x20] sm:$0xff] %v2039_v45  ;;  %2080 = vst [vmem:[#allocation7 + $0x28] sm:$0xff] %v2040_v54  ;;  %v1813_v11 = vpop.permute.xlu1 %1812  ;;  %v1818_v12 = vpop.permute.xlu0 %1817 }
 0x3a9   :  { %v1901_v56 = vmul.f32 %v1813_v11, %v3052_v60  ;;  %v1902_v22 = vmul.f32 %v1813_v11, %v3055_v19  ;;  %v1903_v57 = vmul.f32 %v2964_v32, %v1818_v12  ;;  %v1904_v58 = vmul.f32 %v2966_v63, %v1818_v12 }
 0x3ac   :  { %v1953_v38 = vpop.permute.xlu1 %1952  ;;  %v1958_v62 = vpop.permute.xlu0 %1957 }
 0x3ad   :  { %v2041_v40 = vadd.f32 %v1953_v38, %v1901_v56  ;;  %v2042_v50 = vadd.f32 %v1953_v38, %v1902_v22  ;;  %v2043_v20 = vadd.f32 %v1958_v62, %v1903_v57  ;;  %v2044_v31 = vadd.f32 %v1958_v62, %v1904_v58  ;;  %v3549_v56 = vld [vmem:[#allocation12_spill] sm:$0xff]  ;;  %v3550_v22 = vld [vmem:[#allocation13_spill] sm:$0xff]  ;;  %v3551_v57 = vld [vmem:[#allocation14_spill] sm:$0xff] }
 0x3ae   :  { %v3552_v58 = vld [vmem:[#allocation15_spill] sm:$0xff] }
 0x3af   :  { %2081 = vst [vmem:[#allocation7 + $0x30] sm:$0xff] %v2041_v40  ;;  %2082 = vst [vmem:[#allocation7 + $0x38] sm:$0xff] %v2042_v50 }
 0x3b0   :  { %2083 = vst [vmem:[#allocation7 + $0x40] sm:$0xff] %v2043_v20  ;;  %2084 = vst [vmem:[#allocation7 + $0x48] sm:$0xff] %v2044_v31  ;;  %v1823_v36 = vpop.permute.xlu1 %1822  ;;  %v1828_v33 = vpop.permute.xlu0 %1827 }
 0x3b1   :  { %v1905_v60 = vmul.f32 %v2968_v6, %v1823_v36  ;;  %v1906_v19 = vmul.f32 %v2970_v39, %v1823_v36  ;;  %v1907_v32 = vmul.f32 %v2972_v13, %v1828_v33  ;;  %v1908_v63 = vmul.f32 %v2974_v14, %v1828_v33 }
 0x3b4   :  { %v1963_v46 = vpop.permute.xlu1 %1962  ;;  %v1968_v43 = vpop.permute.xlu0 %1967 }
 0x3b5   :  { %v2045_v3 = vadd.f32 %v1963_v46, %v1905_v60  ;;  %v2046_v8 = vadd.f32 %v1963_v46, %v1906_v19  ;;  %v2047_v26 = vadd.f32 %v1968_v43, %v1907_v32  ;;  %v2048_v61 = vadd.f32 %v1968_v43, %v1908_v63  ;;  %v3553_v19 = vld [vmem:[#allocation16_spill] sm:$0xff]  ;;  %v3554_v63 = vld [vmem:[#allocation17_spill] sm:$0xff]  ;;  %v3555_v43 = vld [vmem:[#allocation18_spill] sm:$0xff] }
 0x3b7   :  { %2085 = vst [vmem:[#allocation7 + $0x50] sm:$0xff] %v2045_v3  ;;  %2086 = vst [vmem:[#allocation7 + $0x58] sm:$0xff] %v2046_v8  ;;  %v3556_v8 = vld [vmem:[#allocation19_spill] sm:$0xff] }
 0x3b8   :  { %2087 = vst [vmem:[#allocation7 + $0x60] sm:$0xff] %v2047_v26  ;;  %2088 = vst [vmem:[#allocation7 + $0x68] sm:$0xff] %v2048_v61  ;;  %v1833_v51 = vpop.permute.xlu1 %1832  ;;  %v1838_v5 = vpop.permute.xlu0 %1837 }
 0x3b9   :  { %v1909_v6 = vmul.f32 %v2976_v47, %v1833_v51  ;;  %v1910_v39 = vmul.f32 %v2978_v16, %v1833_v51  ;;  %v1911_v13 = vmul.f32 %v2980_v18, %v1838_v5  ;;  %v1912_v14 = vmul.f32 %v2982_v1, %v1838_v5 }
 0x3bc   :  { %v1973_v15 = vpop.permute.xlu1 %1972  ;;  %v1978_v27 = vpop.permute.xlu0 %1977 }
 0x3bd   :  { %v2049_v21 = vadd.f32 %v1973_v15, %v1909_v6  ;;  %v2050_v37 = vadd.f32 %v1973_v15, %v1910_v39  ;;  %v2051_v28 = vadd.f32 %v1978_v27, %v1911_v13  ;;  %v2052_v29 = vadd.f32 %v1978_v27, %v1912_v14  ;;  %v3557_v27 = vld [vmem:[#allocation20_spill] sm:$0xff] }
 0x3bf   :  { %2089 = vst [vmem:[#allocation7 + $0x70] sm:$0xff] %v2049_v21  ;;  %2090 = vst [vmem:[#allocation7 + $0x78] sm:$0xff] %v2050_v37  ;;  %v3558_v37 = vld [vmem:[#allocation21_spill] sm:$0xff] }
 0x3c0   :  { %2091 = vst [vmem:[#allocation7 + $0x80] sm:$0xff] %v2051_v28  ;;  %2092 = vst [vmem:[#allocation7 + $0x88] sm:$0xff] %v2052_v29  ;;  %v1843_v53 = vpop.permute.xlu1 %1842  ;;  %v1848_v9 = vpop.permute.xlu0 %1847  ;;  %v3559_v29 = vld [vmem:[#allocation22_spill] sm:$0xff] }
 0x3c1   :  { %v1913_v47 = vmul.f32 %v2984_v7, %v1843_v53  ;;  %v1914_v16 = vmul.f32 %v2986_v52, %v1843_v53  ;;  %v1915_v18 = vmul.f32 %v2988_v17, %v1848_v9  ;;  %v1916_v1 = vmul.f32 %v2990_v23, %v1848_v9  ;;  %v3560_v9 = vld [vmem:[#allocation23_spill] sm:$0xff] }
 0x3c4   :  { %v1983_v49 = vpop.permute.xlu1 %1982  ;;  %v1988_v4 = vpop.permute.xlu0 %1987 }
 0x3c5   :  { %v2053_v24 = vadd.f32 %v1983_v49, %v1913_v47  ;;  %v2054_v44 = vadd.f32 %v1983_v49, %v1914_v16  ;;  %v2055_v48 = vadd.f32 %v1988_v4, %v1915_v18  ;;  %v2056_v55 = vadd.f32 %v1988_v4, %v1916_v1 }
 0x3c7   :  { %2093 = vst [vmem:[#allocation7 + $0x90] sm:$0xff] %v2053_v24  ;;  %2094 = vst [vmem:[#allocation7 + $0x98] sm:$0xff] %v2054_v44 }
 0x3c8   :  { %2095 = vst [vmem:[#allocation7 + $0xa0] sm:$0xff] %v2055_v48  ;;  %2096 = vst [vmem:[#allocation7 + $0xa8] sm:$0xff] %v2056_v55  ;;  %v1853_v25 = vpop.permute.xlu1 %1852  ;;  %v1858_v42 = vpop.permute.xlu0 %1857  ;;  %v3561_v48 = vld [vmem:[#allocation24_spill] sm:$0xff] }
 0x3c9   :  { %v1917_v7 = vmul.f32 %v2992_v41, %v1853_v25  ;;  %v1918_v52 = vmul.f32 %v2994_v2, %v1853_v25  ;;  %v1919_v17 = vmul.f32 %v2996_v0, %v1858_v42  ;;  %v1920_v23 = vmul.f32 %v3548_v34, %v1858_v42  ;;  %v3562_v25 = vld [vmem:[#allocation25_spill] sm:$0xff] }
 0x3cc   :  { %v1993_v10 = vpop.permute.xlu1 %1992  ;;  %v1998_v35 = vpop.permute.xlu0 %1997 }
 0x3cd   :  { %v2057_v30 = vadd.f32 %v1993_v10, %v1917_v7  ;;  %v2058_v59 = vadd.f32 %v1993_v10, %v1918_v52  ;;  %v2059_v45 = vadd.f32 %v1998_v35, %v1919_v17  ;;  %v2060_v54 = vadd.f32 %v1998_v35, %v1920_v23 }
 0x3cf   :  { %2097 = vst [vmem:[#allocation7 + $0xb0] sm:$0xff] %v2057_v30  ;;  %2098 = vst [vmem:[#allocation7 + $0xb8] sm:$0xff] %v2058_v59 }
 0x3d0   :  { %2099 = vst [vmem:[#allocation7 + $0xc0] sm:$0xff] %v2059_v45  ;;  %2100 = vst [vmem:[#allocation7 + $0xc8] sm:$0xff] %v2060_v54  ;;  %v1863_v11 = vpop.permute.xlu1 %1862  ;;  %v1868_v12 = vpop.permute.xlu0 %1867 }
 0x3d1   :  { %v1921_v41 = vmul.f32 %v3549_v56, %v1863_v11  ;;  %v1922_v2 = vmul.f32 %v3550_v22, %v1863_v11  ;;  %v1923_v0 = vmul.f32 %v3551_v57, %v1868_v12  ;;  %v1924_v38 = vmul.f32 %v3552_v58, %v1868_v12 }
 0x3d4   :  { %v2003_v62 = vpop.permute.xlu1 %2002  ;;  %v2008_v40 = vpop.permute.xlu0 %2007 }
 0x3d5   :  { %v2061_v50 = vadd.f32 %v2003_v62, %v1921_v41  ;;  %v2062_v20 = vadd.f32 %v2003_v62, %v1922_v2  ;;  %v2063_v31 = vadd.f32 %v2008_v40, %v1923_v0  ;;  %v2064_v36 = vadd.f32 %v2008_v40, %v1924_v38 }
 0x3d7   :  { %2101 = vst [vmem:[#allocation7 + $0xd0] sm:$0xff] %v2061_v50  ;;  %2102 = vst [vmem:[#allocation7 + $0xd8] sm:$0xff] %v2062_v20 }
 0x3d8   :  { %2103 = vst [vmem:[#allocation7 + $0xe0] sm:$0xff] %v2063_v31  ;;  %2104 = vst [vmem:[#allocation7 + $0xe8] sm:$0xff] %v2064_v36  ;;  %v1873_v33 = vpop.permute.xlu1 %1872  ;;  %v1878_v60 = vpop.permute.xlu0 %1877 }
 0x3d9   :  { %v1925_v32 = vmul.f32 %v3553_v19, %v1873_v33  ;;  %v1926_v46 = vmul.f32 %v3554_v63, %v1873_v33  ;;  %v1927_v3 = vmul.f32 %v3555_v43, %v1878_v60  ;;  %v1928_v26 = vmul.f32 %v3556_v8, %v1878_v60 }
 0x3dc   :  { %v2013_v61 = vpop.permute.xlu1 %2012  ;;  %v2018_v51 = vpop.permute.xlu0 %2017 }
 0x3dd   :  { %v2065_v5 = vadd.f32 %v2013_v61, %v1925_v32  ;;  %v2066_v6 = vadd.f32 %v2013_v61, %v1926_v46  ;;  %v2067_v39 = vadd.f32 %v2018_v51, %v1927_v3  ;;  %v2068_v13 = vadd.f32 %v2018_v51, %v1928_v26 }
 0x3df   :  { %2105 = vst [vmem:[#allocation7 + $0xf0] sm:$0xff] %v2065_v5  ;;  %2106 = vst [vmem:[#allocation7 + $0xf8] sm:$0xff] %v2066_v6 }
 0x3e0   :  { %2107 = vst [vmem:[#allocation7 + $0x100] sm:$0xff] %v2067_v39  ;;  %2108 = vst [vmem:[#allocation7 + $0x108] sm:$0xff] %v2068_v13  ;;  %v1883_v14 = vpop.permute.xlu1 %1882  ;;  %v1888_v15 = vpop.permute.xlu0 %1887 }
 0x3e1   :  { %v1929_v21 = vmul.f32 %v3557_v27, %v1883_v14  ;;  %v1930_v28 = vmul.f32 %v3558_v37, %v1883_v14  ;;  %v1931_v53 = vmul.f32 %v3559_v29, %v1888_v15  ;;  %v1932_v47 = vmul.f32 %v3560_v9, %v1888_v15 }
 0x3e4   :  { %v2023_v16 = vpop.permute.xlu1 %2022  ;;  %v2028_v18 = vpop.permute.xlu0 %2027 }
 0x3e5   :  { %v2069_v1 = vadd.f32 %v2023_v16, %v1929_v21  ;;  %v2070_v49 = vadd.f32 %v2023_v16, %v1930_v28  ;;  %v2071_v4 = vadd.f32 %v2028_v18, %v1931_v53  ;;  %v2072_v24 = vadd.f32 %v2028_v18, %v1932_v47 }
 0x3e7   :  { %2109 = vst [vmem:[#allocation7 + $0x110] sm:$0xff] %v2069_v1  ;;  %2110 = vst [vmem:[#allocation7 + $0x118] sm:$0xff] %v2070_v49 }
 0x3e8   :  { %2111 = vst [vmem:[#allocation7 + $0x120] sm:$0xff] %v2071_v4  ;;  %2112 = vst [vmem:[#allocation7 + $0x128] sm:$0xff] %v2072_v24  ;;  %v1893_v44 = vpop.permute.xlu1 %1892 }
 0x3e9   :  { %v1933_v55 = vmul.f32 %v3561_v48, %v1893_v44  ;;  %v1934_v42 = vmul.f32 %v3562_v25, %v1893_v44 }
 0x3ec   :  { %v2033_v7 = vpop.permute.xlu1 %2032 }
 0x3ed   :  { %v2073_v52 = vadd.f32 %v2033_v7, %v1933_v55  ;;  %v2074_v17 = vadd.f32 %v2033_v7, %v1934_v42 }
 0x3ef   :  { %2113 = vst [vmem:[#allocation7 + $0x130] sm:$0xff] %v2073_v52  ;;  %2114 = vst [vmem:[#allocation7 + $0x138] sm:$0xff] %v2074_v17 }
 0x3f0   :  { %2592 = shalt.err (!%p2589_p6)
}
 0x3f1   :  { %s2593_s25 = scalar_lea.hbm %s3517_s5, 5120 }
 0x3f2   :  { %p2594_p7 = scmp.ne.s32.totalorder %s3517_s5, %s2593_s25  ;;  %p2597_p8 = scmp.lt.u32.totalorder %s2593_s25, %s3517_s5 }
 0x3f4   :  { %p2599_p9 = pnand %p2597_p8, %p2594_p7 }
 0x3f6   :  { %2602 = shalt.err (!%p2599_p9)
}
 0x3f7   :  { %2126 = dma.vmem_to_hbm [thread:$0]  %s2121_s4, 5120, %s3517_s5, [#allocation4], %s2610_s28, %s2610_s28, %s2611_s29  }
 0x3f8   :  { %2607 = dma.done.wait [#allocation4], 5120  }
 0x3f9   :  { %2608 = vsyncadd [#allocation4], 4294962176 }
 0x3fa   :  { %2130 = vsyncpa [#allocation3], 1 }
 0x3fb   :  { %2131 = vsyncpa [#allocation6], 1 }
 0x3fc   :  { %2132 = vsyncpa [#allocation4], 1 }

</bundles_post_ra>
